<compile_context>
chip_gen: v7x
topology: tpu7x:2x2x1
jax: 0.10.0
libtpu: 0.0.40
codegen_flags: <defaults>
</compile_context>

<pallas_src>
import functools

import numpy as np
import jax
import jax.numpy as jnp
from jax.experimental import pallas as pl
from jax.experimental.pallas import tpu as pltpu

# ----------------------------- model hyper-params (small, consistent with module) --
D_MODEL = 32          # module default is 64; shrunk for a small synthetic run
NHEAD = 4
NUM_LAYERS = 2
DIM_FF = 64
SEQ = 8
BATCH = 2
EPS = 1e-5            # PyTorch LayerNorm default eps
DPAD = 128            # lane-dense padded width used for everything in-kernel
NEG_INF = -1e30

WROWS = DPAD          # rows occupied by each packed (padded) weight matrix
BIAS_ROWS = 16        # rows of the per-layer bias/gain block
(BQ, BK, BV, BO, B1, B2, G1, BE1, G2, BE2) = range(10)   # bias-block row indices

_VMEM = pl.BlockSpec(memory_space=pltpu.MemorySpace.VMEM)


# ----------------------------------------------------------------------------------
# Packed-slab layout (shared by the host-side packer and the kernel).
# ----------------------------------------------------------------------------------
def _slab_layout(seq, batch, nhead, num_layers):
    R = seq * batch
    HR = nhead * R
    off = {}
    off['pe'] = 0                       # (R, DPAD)     positional encoding, flattened
    off['headmask'] = R                 # (HR, DPAD)    1.0 where row's head == col's head
    off['addmask'] = R + HR             # (HR, R)       0 / -1e30 same-batch mask
    off['selmask'] = R + 2 * HR         # (R, HR)       folds H head-blocks back to R rows
    off['layer0'] = R + 2 * HR + R
    off['layer_rows'] = 6 * WROWS + BIAS_ROWS
    off['wout'] = off['layer0'] + num_layers * off['layer_rows']
    off['bout'] = off['wout'] + WROWS
    off['total'] = off['bout'] + 8
    return off


# ----------------------------------------------------------------------------------
# Fused Pallas kernel: pos-enc + N encoder layers + last-token slice + output linear
#
# Row layout: the (S, B, D) input is flattened to rows r = s*B + b (s-major) and
# lane-padded to 128; padded lanes are kept exactly zero for the whole kernel.
# ----------------------------------------------------------------------------------
def fused_forward_kernel(src_ref, slab_ref, o_ref, *, d_model, nhead, num_layers,
                         seq, batch):
    f32 = jnp.float32
    R = seq * batch
    H = nhead
    Dh = d_model // H
    HR = H * R
    scale = 1.0 / float(Dh) ** 0.5
    off = _slab_layout(seq, batch, nhead, num_layers)

    def layernorm_padded(y, gamma, beta):
        # y is zero in cols >= d_model; E[x^2]-mu^2 keeps the statistics over the
        # real d_model only, and zero-padded gamma/beta keep the pads at zero.
        mu = jnp.sum(y, axis=-1, keepdims=True) * (1.0 / d_model)
        ex2 = jnp.sum(y * y, axis=-1, keepdims=True) * (1.0 / d_model)
        inv = jax.lax.rsqrt(ex2 - mu * mu + EPS)
        return (y - mu) * inv * gamma + beta

    # --- structure constants: all live in the single slab (no extra DMAs) ----------
    pe = slab_ref[off['pe']:off['pe'] + R, :]                        # (R, DPAD)
    headmask = slab_ref[off['headmask']:off['headmask'] + HR, :]     # (HR, DPAD)
    addmask = slab_ref[off['addmask']:off['addmask'] + HR, 0:R]      # (HR, R)
    selmask = slab_ref[off['selmask']:off['selmask'] + R, 0:HR]      # (R, HR)

    # residual stream: lane-dense (R, DPAD); cols >= d_model stay exactly zero.
    x = src_ref[...].astype(f32) + pe

    for l in range(num_layers):
        base = off['layer0'] + l * off['layer_rows']
        wq = slab_ref[base + 0 * WROWS:base + 1 * WROWS, :]
        wk = slab_ref[base + 1 * WROWS:base + 2 * WROWS, :]
        wv = slab_ref[base + 2 * WROWS:base + 3 * WROWS, :]
        wo = slab_ref[base + 3 * WROWS:base + 4 * WROWS, :]
        w1 = slab_ref[base + 4 * WROWS:base + 5 * WROWS, :]
        w2 = slab_ref[base + 5 * WROWS:base + 6 * WROWS, :]
        boff = base + 6 * WROWS

        def brow(i, _b=boff):
            return slab_ref[_b + i:_b + i + 1, :]

        bq, bk, bv, bo = brow(BQ), brow(BK), brow(BV), brow(BO)
        b1, b2 = brow(B1), brow(B2)
        g1, be1, g2, be2 = brow(G1), brow(BE1), brow(G2), brow(BE2)

        # --- QKV projections: aligned full-lane matmuls (no sub-vreg lane slicing) --
        q = (jnp.dot(x, wq, preferred_element_type=f32) + bq) * scale
        k = jnp.dot(x, wk, preferred_element_type=f32) + bk
        v = jnp.dot(x, wv, preferred_element_type=f32) + bv

        # --- head-expanded queries: row m = h*R + r is query r masked to head h ----
        qexp = jnp.tile(q, (H, 1)) * headmask                          # (HR, DPAD)

        # scores[m, rc] = <q_r | head h, k_rc>.  K is NOT head-expanded, so the
        # implicit RHS transpose only touches the small (R, DPAD) key block.
        s = jax.lax.dot_general(qexp, k, (((1,), (1,)), ((), ())),
                                preferred_element_type=f32) + addmask  # (HR, R)

        # Exact per-(head, query) softmax: each row is one head/query pair, so the
        # row max IS the per-head max (no cross-head underflow / div-by-zero).
        m = jnp.max(s, axis=-1, keepdims=True)
        p = jnp.exp(s - m)
        denom = jnp.sum(p, axis=-1, keepdims=True)                     # >= 1
        w = p * pl.reciprocal(denom, approx=True)

        # Context: per-head rows -> mask to that head's columns -> fold the H row
        # blocks back into the (R, DPAD) "concatenated heads" layout with one matmul.
        ctxe = jnp.dot(w, v, preferred_element_type=f32) * headmask    # (HR, DPAD)
        ctx = jnp.dot(selmask, ctxe, preferred_element_type=f32)       # (R, DPAD)
        attn = jnp.dot(ctx, wo, preferred_element_type=f32) + bo

        # --- residual + LayerNorm 1 (post-norm) -------------------------------------
        h1 = layernorm_padded(x + attn, g1, be1)

        # --- FFN at full 128-lane width (dim_ff zero-padded; ReLU(0)=0, w2 pad rows 0)
        f = jnp.maximum(jnp.dot(h1, w1, preferred_element_type=f32) + b1, 0.0)
        ffn = jnp.dot(f, w2, preferred_element_type=f32) + b2

        # --- residual + LayerNorm 2 --------------------------------------------------
        x = layernorm_padded(h1 + ffn, g2, be2)

    # --- last sequence position (rows (S-1)*B .. (S-1)*B + B-1) + output linear -----
    wout = slab_ref[off['wout']:off['wout'] + WROWS, :]
    bout = slab_ref[off['bout']:off['bout'] + 1, :]
    last = x[R - batch:, :]                                            # (B, DPAD)
    out = jnp.dot(last, wout, preferred_element_type=f32) + bout       # (B, DPAD)
    o_ref[...] = out.astype(o_ref.dtype)


# ----------------------------------------------------------------------------------
# Wrapper: single gridless pallas_call, exactly two inputs (activations + slab).
# ----------------------------------------------------------------------------------
def make_forward(d_model, nhead, num_layers, seq, batch):
    R = seq * batch
    HR = nhead * R
    off = _slab_layout(seq, batch, nhead, num_layers)
    kernel = functools.partial(fused_forward_kernel, d_model=d_model, nhead=nhead,
                               num_layers=num_layers, seq=seq, batch=batch)
    flops = (num_layers * (6 * 2 * R * DPAD * DPAD + 3 * 2 * HR * R * DPAD)
             + 2 * batch * DPAD * DPAD)
    cost = pl.CostEstimate(
        flops=flops,
        transcendentals=num_layers * (HR * R + HR + 2 * R),
        bytes_accessed=4 * (R * DPAD + off['total'] * DPAD + batch * DPAD))

    @jax.jit
    def forward(src, slab):
        # Only per-call prep: flatten (S, B, D) -> (S*B, D) and lane-pad to 128.
        src2 = jnp.pad(src.reshape(R, d_model).astype(jnp.float32),
                       ((0, 0), (0, DPAD - d_model)))
        out = pl.pallas_call(
            kernel,
            out_shape=jax.ShapeDtypeStruct((batch, DPAD), jnp.float32),
            in_specs=[_VMEM, _VMEM],
            out_specs=_VMEM,
            cost_estimate=cost,
        )(src2, slab)
        return out[:, :2]

    return forward


# ----------------------------------------------------------------------------------
# Host-side, one-time packing of PE + structure masks + all weights into one slab.
# ----------------------------------------------------------------------------------
def _sinusoidal_pe(seq, d_model):
    position = np.arange(seq, dtype=np.float32)[:, None]
    div_term = np.exp(np.arange(0, d_model, 2, dtype=np.float32)
                      * (-np.log(10000.0) / d_model))
    pe = np.zeros((seq, d_model), np.float32)
    pe[:, 0::2] = np.sin(position * div_term)
    pe[:, 1::2] = np.cos(position * div_term)
    return pe


def pack_params(params, seq, batch, d_model, nhead, num_layers):
    R = seq * batch
    HR = nhead * R
    Dh = d_model // nhead
    off = _slab_layout(seq, batch, nhead, num_layers)
    slab = np.zeros((off['total'], DPAD), np.float32)

    # positional encoding, flattened to rows r = s*B + b
    pe = _sinusoidal_pe(seq, d_model)
    slab[off['pe']:off['pe'] + R, :d_model] = np.repeat(pe, batch, axis=0)

    # head-column mask: block h keeps columns of head h
    for h in range(nhead):
        slab[off['headmask'] + h * R: off['headmask'] + (h + 1) * R,
             h * Dh:(h + 1) * Dh] = 1.0

    # additive batch mask: query row m = h*R + s*B + b only sees keys of batch b
    qb = (np.arange(HR) % R) % batch
    kb = np.arange(R) % batch
    slab[off['addmask']:off['addmask'] + HR, :R] = np.where(
        qb[:, None] == kb[None, :], 0.0, NEG_INF)

    # fold matrix: sel[r, h*R + r] = 1 sums the H head blocks back to R rows
    sel = (np.arange(HR)[None, :] % R == np.arange(R)[:, None]).astype(np.float32)
    slab[off['selmask']:off['selmask'] + R, :HR] = sel

    for l, lp in enumerate(params['layers']):
        base = off['layer0'] + l * off['layer_rows']
        for i, name in enumerate(('wq_t', 'wk_t', 'wv_t', 'wo_t', 'w1_t', 'w2_t')):
            w = np.asarray(lp[name])
            slab[base + i * WROWS: base + i * WROWS + w.shape[0], :w.shape[1]] = w
        boff = base + 6 * WROWS
        for idx, name in ((BQ, 'bq'), (BK, 'bk'), (BV, 'bv'), (BO, 'bo'),
                          (B1, 'b1'), (B2, 'b2'), (G1, 'g1'), (BE1, 'be1'),
                          (G2, 'g2'), (BE2, 'be2')):
            b = np.asarray(lp[name]).reshape(-1)
            slab[boff + idx, :b.shape[0]] = b

    wout = np.asarray(params['wout_t'])
    slab[off['wout']:off['wout'] + wout.shape[0], :wout.shape[1]] = wout
    bout = np.asarray(params['bout']).reshape(-1)
    slab[off['bout'], :bout.shape[0]] = bout
    return jnp.asarray(slab)


# ----------------------------------------------------------------------------------
# Deterministic parameter init (synthetic; shapes follow nn.TransformerEncoderLayer)
# ----------------------------------------------------------------------------------
def init_params(key, d_model, nhead, num_layers, dim_ff):
    layers = []
    for _ in range(num_layers):
        key, kq, kk, kv, ko, k1, k2, kb = jax.random.split(key, 8)
        kb1, kb2, kb3, kb4, kb5, kb6 = jax.random.split(kb, 6)
        layers.append(dict(
            wq_t=0.02 * jax.random.normal(kq, (d_model, d_model), jnp.float32),
            wk_t=0.02 * jax.random.normal(kk, (d_model, d_model), jnp.float32),
            wv_t=0.02 * jax.random.normal(kv, (d_model, d_model), jnp.float32),
            wo_t=0.02 * jax.random.normal(ko, (d_model, d_model), jnp.float32),
            w1_t=0.02 * jax.random.normal(k1, (d_model, dim_ff), jnp.float32),
            w2_t=0.02 * jax.random.normal(k2, (dim_ff, d_model), jnp.float32),
            bq=0.01 * jax.random.normal(kb1, (d_model,), jnp.float32),
            bk=0.01 * jax.random.normal(kb2, (d_model,), jnp.float32),
            bv=0.01 * jax.random.normal(kb3, (d_model,), jnp.float32),
            bo=0.01 * jax.random.normal(kb4, (d_model,), jnp.float32),
            b1=0.01 * jax.random.normal(kb5, (dim_ff,), jnp.float32),
            b2=0.01 * jax.random.normal(kb6, (d_model,), jnp.float32),
            g1=jnp.ones((d_model,), jnp.float32),
            be1=jnp.zeros((d_model,), jnp.float32),
            g2=jnp.ones((d_model,), jnp.float32),
            be2=jnp.zeros((d_model,), jnp.float32),
        ))
    key, kout = jax.random.split(key)
    wout_t = 0.02 * jax.random.normal(kout, (d_model, 2), jnp.float32)
    return dict(layers=layers, wout_t=wout_t, bout=jnp.zeros((2,), jnp.float32))


# ----------------------------------------------------------------------------------
# Pure-JAX reference (standard per-head formulation) for a correctness check
# ----------------------------------------------------------------------------------
def reference_forward(src, params, nhead):
    S, B, D = src.shape
    Dh = D // nhead
    pe = jnp.asarray(_sinusoidal_pe(S, D))
    x = jnp.transpose(src + pe[:, None, :], (1, 0, 2))               # (B, S, D)

    def ln(y, g, b):
        mu = jnp.mean(y, axis=-1, keepdims=True)
        yc = y - mu
        var = jnp.mean(yc * yc, axis=-1, keepdims=True)
        return yc * jax.lax.rsqrt(var + EPS) * g + b

    for lp in params['layers']:
        x2 = x.reshape(B * S, D)
        q = (x2 @ lp['wq_t'] + lp['bq']) / jnp.sqrt(float(Dh))
        k = x2 @ lp['wk_t'] + lp['bk']
        v = x2 @ lp['wv_t'] + lp['bv']
        q = q.reshape(B, S, nhead, Dh).transpose(0, 2, 1, 3)
        k = k.reshape(B, S, nhead, Dh).transpose(0, 2, 1, 3)
        v = v.reshape(B, S, nhead, Dh).transpose(0, 2, 1, 3)
        p = jax.nn.softmax(jnp.einsum('bhqd,bhkd->bhqk', q, k), axis=-1)
        ctx = jnp.einsum('bhqk,bhkd->bhqd', p, v).transpose(0, 2, 1, 3).reshape(B * S, D)
        attn = ctx @ lp['wo_t'] + lp['bo']
        h1 = ln(x2 + attn, lp['g1'], lp['be1'])
        f = jnp.maximum(h1 @ lp['w1_t'] + lp['b1'], 0.0) @ lp['w2_t'] + lp['b2']
        x = ln(h1 + f, lp['g2'], lp['be2']).reshape(B, S, D)
    return x[:, -1, :] @ params['wout_t'] + params['bout']


# ----------------------------------------------------------------------------------
if __name__ == "__main__":
    key = jax.random.PRNGKey(0)
    key, k_src, k_par = jax.random.split(key, 3)

    src = jax.random.normal(k_src, (SEQ, BATCH, D_MODEL), jnp.float32)   # (S, B, D)
    params = init_params(k_par, D_MODEL, NHEAD, NUM_LAYERS, DIM_FF)
    slab = pack_params(params, SEQ, BATCH, D_MODEL, NHEAD, NUM_LAYERS)   # one-time pack
    forward = make_forward(D_MODEL, NHEAD, NUM_LAYERS, SEQ, BATCH)

    out = jax.block_until_ready(forward(src, slab))

    ref = reference_forward(src, params, NHEAD)
    assert out.shape == (BATCH, 2), out.shape
    assert bool(jnp.all(jnp.isfinite(out)))
    assert bool(jnp.allclose(out, ref, atol=1e-2, rtol=1e-2)), (out, ref)

    print("KERNEL_OK")
</pallas_src>

<mosaic_0001>
module attributes {stable_mosaic.version = 11 : i64} {
  func.func @fused_forward_kernel(%arg0: memref<16x128xf32, #tpu.memory_space<vmem>>, %arg1: memref<1864x128xf32, #tpu.memory_space<vmem>>, %arg2: memref<2x128xf32, #tpu.memory_space<vmem>>) attributes {dimension_semantics = [], scalar_prefetch = 0 : i64, scratch_operands = 0 : i64, tpu.core_type = #tpu.core_type<tc>} {
    %c0 = arith.constant 0 : index
    %c0_0 = arith.constant 0 : index
    %0 = vector.load %arg1[%c0, %c0_0] : memref<1864x128xf32, #tpu.memory_space<vmem>>, vector<16x128xf32>
    %c16 = arith.constant 16 : index
    %c0_1 = arith.constant 0 : index
    %1 = vector.load %arg1[%c16, %c0_1] : memref<1864x128xf32, #tpu.memory_space<vmem>>, vector<64x128xf32>
    %c80 = arith.constant 80 : index
    %c0_2 = arith.constant 0 : index
    %2 = vector.load %arg1[%c80, %c0_2] : memref<1864x128xf32, #tpu.memory_space<vmem>>, vector<64x16xf32>
    %c144 = arith.constant 144 : index
    %c0_3 = arith.constant 0 : index
    %3 = vector.load %arg1[%c144, %c0_3] : memref<1864x128xf32, #tpu.memory_space<vmem>>, vector<16x64xf32>
    %c0_4 = arith.constant 0 : index
    %c0_5 = arith.constant 0 : index
    %4 = vector.load %arg0[%c0_4, %c0_5] : memref<16x128xf32, #tpu.memory_space<vmem>>, vector<16x128xf32>
    %5 = arith.addf %4, %0 : vector<16x128xf32>
    %c160 = arith.constant 160 : index
    %c0_6 = arith.constant 0 : index
    %6 = vector.load %arg1[%c160, %c0_6] : memref<1864x128xf32, #tpu.memory_space<vmem>>, vector<128x128xf32>
    %c288 = arith.constant 288 : index
    %c0_7 = arith.constant 0 : index
    %7 = vector.load %arg1[%c288, %c0_7] : memref<1864x128xf32, #tpu.memory_space<vmem>>, vector<128x128xf32>
    %c416 = arith.constant 416 : index
    %c0_8 = arith.constant 0 : index
    %8 = vector.load %arg1[%c416, %c0_8] : memref<1864x128xf32, #tpu.memory_space<vmem>>, vector<128x128xf32>
    %c544 = arith.constant 544 : index
    %c0_9 = arith.constant 0 : index
    %9 = vector.load %arg1[%c544, %c0_9] : memref<1864x128xf32, #tpu.memory_space<vmem>>, vector<128x128xf32>
    %c672 = arith.constant 672 : index
    %c0_10 = arith.constant 0 : index
    %10 = vector.load %arg1[%c672, %c0_10] : memref<1864x128xf32, #tpu.memory_space<vmem>>, vector<128x128xf32>
    %c800 = arith.constant 800 : index
    %c0_11 = arith.constant 0 : index
    %11 = vector.load %arg1[%c800, %c0_11] : memref<1864x128xf32, #tpu.memory_space<vmem>>, vector<128x128xf32>
    %c928 = arith.constant 928 : index
    %c0_12 = arith.constant 0 : index
    %12 = vector.load %arg1[%c928, %c0_12] : memref<1864x128xf32, #tpu.memory_space<vmem>>, vector<1x128xf32>
    %c929 = arith.constant 929 : index
    %c0_13 = arith.constant 0 : index
    %13 = vector.load %arg1[%c929, %c0_13] : memref<1864x128xf32, #tpu.memory_space<vmem>>, vector<1x128xf32>
    %c930 = arith.constant 930 : index
    %c0_14 = arith.constant 0 : index
    %14 = vector.load %arg1[%c930, %c0_14] : memref<1864x128xf32, #tpu.memory_space<vmem>>, vector<1x128xf32>
    %c931 = arith.constant 931 : index
    %c0_15 = arith.constant 0 : index
    %15 = vector.load %arg1[%c931, %c0_15] : memref<1864x128xf32, #tpu.memory_space<vmem>>, vector<1x128xf32>
    %c932 = arith.constant 932 : index
    %c0_16 = arith.constant 0 : index
    %16 = vector.load %arg1[%c932, %c0_16] : memref<1864x128xf32, #tpu.memory_space<vmem>>, vector<1x128xf32>
    %c933 = arith.constant 933 : index
    %c0_17 = arith.constant 0 : index
    %17 = vector.load %arg1[%c933, %c0_17] : memref<1864x128xf32, #tpu.memory_space<vmem>>, vector<1x128xf32>
    %c934 = arith.constant 934 : index
    %c0_18 = arith.constant 0 : index
    %18 = vector.load %arg1[%c934, %c0_18] : memref<1864x128xf32, #tpu.memory_space<vmem>>, vector<1x128xf32>
    %c935 = arith.constant 935 : index
    %c0_19 = arith.constant 0 : index
    %19 = vector.load %arg1[%c935, %c0_19] : memref<1864x128xf32, #tpu.memory_space<vmem>>, vector<1x128xf32>
    %c936 = arith.constant 936 : index
    %c0_20 = arith.constant 0 : index
    %20 = vector.load %arg1[%c936, %c0_20] : memref<1864x128xf32, #tpu.memory_space<vmem>>, vector<1x128xf32>
    %c937 = arith.constant 937 : index
    %c0_21 = arith.constant 0 : index
    %21 = vector.load %arg1[%c937, %c0_21] : memref<1864x128xf32, #tpu.memory_space<vmem>>, vector<1x128xf32>
    %cst = arith.constant dense<0.000000e+00> : vector<16x128xf32>
    %22 = tpu.matmul %5, %6, %cst {dimension_numbers = #tpu.dot_dimension_numbers<[1], [0], [0], [1], [0, 0, 1, 1], [], []>} : vector<16x128xf32>, vector<128x128xf32>, vector<16x128xf32> -> vector<16x128xf32>
    %23 = vector.broadcast %12 : vector<1x128xf32> to vector<16x128xf32>
    %24 = arith.addf %22, %23 : vector<16x128xf32>
    %cst_22 = arith.constant 0.353553385 : f32
    %25 = vector.broadcast %cst_22 : f32 to vector<16x128xf32>
    %26 = arith.mulf %24, %25 : vector<16x128xf32>
    %cst_23 = arith.constant dense<0.000000e+00> : vector<16x128xf32>
    %27 = tpu.matmul %5, %7, %cst_23 {dimension_numbers = #tpu.dot_dimension_numbers<[1], [0], [0], [1], [0, 0, 1, 1], [], []>} : vector<16x128xf32>, vector<128x128xf32>, vector<16x128xf32> -> vector<16x128xf32>
    %28 = vector.broadcast %13 : vector<1x128xf32> to vector<16x128xf32>
    %29 = arith.addf %27, %28 : vector<16x128xf32>
    %cst_24 = arith.constant dense<0.000000e+00> : vector<16x128xf32>
    %30 = tpu.matmul %5, %8, %cst_24 {dimension_numbers = #tpu.dot_dimension_numbers<[1], [0], [0], [1], [0, 0, 1, 1], [], []>} : vector<16x128xf32>, vector<128x128xf32>, vector<16x128xf32> -> vector<16x128xf32>
    %31 = vector.broadcast %14 : vector<1x128xf32> to vector<16x128xf32>
    %32 = arith.addf %30, %31 : vector<16x128xf32>
    %33 = tpu.concatenate %26, %26, %26, %26 in 0 : vector<16x128xf32>, vector<16x128xf32>, vector<16x128xf32>, vector<16x128xf32> -> vector<64x128xf32>
    %34 = arith.mulf %33, %1 : vector<64x128xf32>
    %cst_25 = arith.constant dense<0.000000e+00> : vector<64x16xf32>
    %35 = tpu.matmul %34, %29, %cst_25 {dimension_numbers = #tpu.dot_dimension_numbers<[1], [1], [0], [0], [0, 0, 1, 0], [], []>} : vector<64x128xf32>, vector<16x128xf32>, vector<64x16xf32> -> vector<64x16xf32>
    %36 = arith.addf %35, %2 : vector<64x16xf32>
    %cst_26 = arith.constant dense<0xFF800000> : vector<64xf32>
    %37 = vector.multi_reduction <maximumf>, %36, %cst_26 [1] : vector<64x16xf32> to vector<64xf32>
    %38 = vector.shape_cast %37 : vector<64xf32> to vector<64x1xf32>
    %39 = vector.broadcast %38 : vector<64x1xf32> to vector<64x16xf32>
    %40 = arith.subf %36, %39 : vector<64x16xf32>
    %41 = math.exp %40 : vector<64x16xf32>
    %cst_27 = arith.constant dense<0.000000e+00> : vector<64xf32>
    %42 = vector.multi_reduction <add>, %41, %cst_27 [1] : vector<64x16xf32> to vector<64xf32>
    %43 = vector.shape_cast %42 : vector<64xf32> to vector<64x1xf32>
    %44 = tpu.reciprocal %43 {approx = true} : vector<64x1xf32> -> vector<64x1xf32>
    %45 = vector.broadcast %44 : vector<64x1xf32> to vector<64x16xf32>
    %46 = arith.mulf %41, %45 : vector<64x16xf32>
    %cst_28 = arith.constant dense<0.000000e+00> : vector<64x128xf32>
    %47 = tpu.matmul %46, %32, %cst_28 {dimension_numbers = #tpu.dot_dimension_numbers<[1], [0], [0], [1], [0, 0, 1, 1], [], []>} : vector<64x16xf32>, vector<16x128xf32>, vector<64x128xf32> -> vector<64x128xf32>
    %48 = arith.mulf %47, %1 : vector<64x128xf32>
    %cst_29 = arith.constant dense<0.000000e+00> : vector<16x128xf32>
    %49 = tpu.matmul %3, %48, %cst_29 {dimension_numbers = #tpu.dot_dimension_numbers<[1], [0], [0], [1], [0, 0, 1, 1], [], []>} : vector<16x64xf32>, vector<64x128xf32>, vector<16x128xf32> -> vector<16x128xf32>
    %cst_30 = arith.constant dense<0.000000e+00> : vector<16x128xf32>
    %50 = tpu.matmul %49, %9, %cst_30 {dimension_numbers = #tpu.dot_dimension_numbers<[1], [0], [0], [1], [0, 0, 1, 1], [], []>} : vector<16x128xf32>, vector<128x128xf32>, vector<16x128xf32> -> vector<16x128xf32>
    %51 = vector.broadcast %15 : vector<1x128xf32> to vector<16x128xf32>
    %52 = arith.addf %50, %51 : vector<16x128xf32>
    %53 = arith.addf %5, %52 : vector<16x128xf32>
    %cst_31 = arith.constant dense<0.000000e+00> : vector<16xf32>
    %54 = vector.multi_reduction <add>, %53, %cst_31 [1] : vector<16x128xf32> to vector<16xf32>
    %55 = vector.shape_cast %54 : vector<16xf32> to vector<16x1xf32>
    %cst_32 = arith.constant 3.125000e-02 : f32
    %56 = vector.broadcast %cst_32 : f32 to vector<16x1xf32>
    %57 = arith.mulf %55, %56 : vector<16x1xf32>
    %58 = arith.mulf %53, %53 : vector<16x128xf32>
    %cst_33 = arith.constant dense<0.000000e+00> : vector<16xf32>
    %59 = vector.multi_reduction <add>, %58, %cst_33 [1] : vector<16x128xf32> to vector<16xf32>
    %60 = vector.shape_cast %59 : vector<16xf32> to vector<16x1xf32>
    %cst_34 = arith.constant 3.125000e-02 : f32
    %61 = vector.broadcast %cst_34 : f32 to vector<16x1xf32>
    %62 = arith.mulf %60, %61 : vector<16x1xf32>
    %63 = arith.mulf %57, %57 : vector<16x1xf32>
    %64 = arith.subf %62, %63 : vector<16x1xf32>
    %cst_35 = arith.constant 9.99999974E-6 : f32
    %65 = vector.broadcast %cst_35 : f32 to vector<16x1xf32>
    %66 = arith.addf %64, %65 : vector<16x1xf32>
    %67 = math.rsqrt %66 : vector<16x1xf32>
    %68 = vector.broadcast %57 : vector<16x1xf32> to vector<16x128xf32>
    %69 = arith.subf %53, %68 : vector<16x128xf32>
    %70 = vector.broadcast %67 : vector<16x1xf32> to vector<16x128xf32>
    %71 = arith.mulf %69, %70 : vector<16x128xf32>
    %72 = vector.broadcast %18 : vector<1x128xf32> to vector<16x128xf32>
    %73 = arith.mulf %71, %72 : vector<16x128xf32>
    %74 = vector.broadcast %19 : vector<1x128xf32> to vector<16x128xf32>
    %75 = arith.addf %73, %74 : vector<16x128xf32>
    %cst_36 = arith.constant dense<0.000000e+00> : vector<16x128xf32>
    %76 = tpu.matmul %75, %10, %cst_36 {dimension_numbers = #tpu.dot_dimension_numbers<[1], [0], [0], [1], [0, 0, 1, 1], [], []>} : vector<16x128xf32>, vector<128x128xf32>, vector<16x128xf32> -> vector<16x128xf32>
    %77 = vector.broadcast %16 : vector<1x128xf32> to vector<16x128xf32>
    %78 = arith.addf %76, %77 : vector<16x128xf32>
    %cst_37 = arith.constant 0.000000e+00 : f32
    %79 = vector.broadcast %cst_37 : f32 to vector<16x128xf32>
    %80 = arith.maximumf %78, %79 : vector<16x128xf32>
    %cst_38 = arith.constant dense<0.000000e+00> : vector<16x128xf32>
    %81 = tpu.matmul %80, %11, %cst_38 {dimension_numbers = #tpu.dot_dimension_numbers<[1], [0], [0], [1], [0, 0, 1, 1], [], []>} : vector<16x128xf32>, vector<128x128xf32>, vector<16x128xf32> -> vector<16x128xf32>
    %82 = vector.broadcast %17 : vector<1x128xf32> to vector<16x128xf32>
    %83 = arith.addf %81, %82 : vector<16x128xf32>
    %84 = arith.addf %75, %83 : vector<16x128xf32>
    %cst_39 = arith.constant dense<0.000000e+00> : vector<16xf32>
    %85 = vector.multi_reduction <add>, %84, %cst_39 [1] : vector<16x128xf32> to vector<16xf32>
    %86 = vector.shape_cast %85 : vector<16xf32> to vector<16x1xf32>
    %cst_40 = arith.constant 3.125000e-02 : f32
    %87 = vector.broadcast %cst_40 : f32 to vector<16x1xf32>
    %88 = arith.mulf %86, %87 : vector<16x1xf32>
    %89 = arith.mulf %84, %84 : vector<16x128xf32>
    %cst_41 = arith.constant dense<0.000000e+00> : vector<16xf32>
    %90 = vector.multi_reduction <add>, %89, %cst_41 [1] : vector<16x128xf32> to vector<16xf32>
    %91 = vector.shape_cast %90 : vector<16xf32> to vector<16x1xf32>
    %cst_42 = arith.constant 3.125000e-02 : f32
    %92 = vector.broadcast %cst_42 : f32 to vector<16x1xf32>
    %93 = arith.mulf %91, %92 : vector<16x1xf32>
    %94 = arith.mulf %88, %88 : vector<16x1xf32>
    %95 = arith.subf %93, %94 : vector<16x1xf32>
    %cst_43 = arith.constant 9.99999974E-6 : f32
    %96 = vector.broadcast %cst_43 : f32 to vector<16x1xf32>
    %97 = arith.addf %95, %96 : vector<16x1xf32>
    %98 = math.rsqrt %97 : vector<16x1xf32>
    %99 = vector.broadcast %88 : vector<16x1xf32> to vector<16x128xf32>
    %100 = arith.subf %84, %99 : vector<16x128xf32>
    %101 = vector.broadcast %98 : vector<16x1xf32> to vector<16x128xf32>
    %102 = arith.mulf %100, %101 : vector<16x128xf32>
    %103 = vector.broadcast %20 : vector<1x128xf32> to vector<16x128xf32>
    %104 = arith.mulf %102, %103 : vector<16x128xf32>
    %105 = vector.broadcast %21 : vector<1x128xf32> to vector<16x128xf32>
    %106 = arith.addf %104, %105 : vector<16x128xf32>
    %c944 = arith.constant 944 : index
    %c0_44 = arith.constant 0 : index
    %107 = vector.load %arg1[%c944, %c0_44] : memref<1864x128xf32, #tpu.memory_space<vmem>>, vector<128x128xf32>
    %c1072 = arith.constant 1072 : index
    %c0_45 = arith.constant 0 : index
    %108 = vector.load %arg1[%c1072, %c0_45] : memref<1864x128xf32, #tpu.memory_space<vmem>>, vector<128x128xf32>
    %c1200 = arith.constant 1200 : index
    %c0_46 = arith.constant 0 : index
    %109 = vector.load %arg1[%c1200, %c0_46] : memref<1864x128xf32, #tpu.memory_space<vmem>>, vector<128x128xf32>
    %c1328 = arith.constant 1328 : index
    %c0_47 = arith.constant 0 : index
    %110 = vector.load %arg1[%c1328, %c0_47] : memref<1864x128xf32, #tpu.memory_space<vmem>>, vector<128x128xf32>
    %c1456 = arith.constant 1456 : index
    %c0_48 = arith.constant 0 : index
    %111 = vector.load %arg1[%c1456, %c0_48] : memref<1864x128xf32, #tpu.memory_space<vmem>>, vector<128x128xf32>
    %c1584 = arith.constant 1584 : index
    %c0_49 = arith.constant 0 : index
    %112 = vector.load %arg1[%c1584, %c0_49] : memref<1864x128xf32, #tpu.memory_space<vmem>>, vector<128x128xf32>
    %c1712 = arith.constant 1712 : index
    %c0_50 = arith.constant 0 : index
    %113 = vector.load %arg1[%c1712, %c0_50] : memref<1864x128xf32, #tpu.memory_space<vmem>>, vector<1x128xf32>
    %c1713 = arith.constant 1713 : index
    %c0_51 = arith.constant 0 : index
    %114 = vector.load %arg1[%c1713, %c0_51] : memref<1864x128xf32, #tpu.memory_space<vmem>>, vector<1x128xf32>
    %c1714 = arith.constant 1714 : index
    %c0_52 = arith.constant 0 : index
    %115 = vector.load %arg1[%c1714, %c0_52] : memref<1864x128xf32, #tpu.memory_space<vmem>>, vector<1x128xf32>
    %c1715 = arith.constant 1715 : index
    %c0_53 = arith.constant 0 : index
    %116 = vector.load %arg1[%c1715, %c0_53] : memref<1864x128xf32, #tpu.memory_space<vmem>>, vector<1x128xf32>
    %c1716 = arith.constant 1716 : index
    %c0_54 = arith.constant 0 : index
    %117 = vector.load %arg1[%c1716, %c0_54] : memref<1864x128xf32, #tpu.memory_space<vmem>>, vector<1x128xf32>
    %c1717 = arith.constant 1717 : index
    %c0_55 = arith.constant 0 : index
    %118 = vector.load %arg1[%c1717, %c0_55] : memref<1864x128xf32, #tpu.memory_space<vmem>>, vector<1x128xf32>
    %c1718 = arith.constant 1718 : index
    %c0_56 = arith.constant 0 : index
    %119 = vector.load %arg1[%c1718, %c0_56] : memref<1864x128xf32, #tpu.memory_space<vmem>>, vector<1x128xf32>
    %c1719 = arith.constant 1719 : index
    %c0_57 = arith.constant 0 : index
    %120 = vector.load %arg1[%c1719, %c0_57] : memref<1864x128xf32, #tpu.memory_space<vmem>>, vector<1x128xf32>
    %c1720 = arith.constant 1720 : index
    %c0_58 = arith.constant 0 : index
    %121 = vector.load %arg1[%c1720, %c0_58] : memref<1864x128xf32, #tpu.memory_space<vmem>>, vector<1x128xf32>
    %c1721 = arith.constant 1721 : index
    %c0_59 = arith.constant 0 : index
    %122 = vector.load %arg1[%c1721, %c0_59] : memref<1864x128xf32, #tpu.memory_space<vmem>>, vector<1x128xf32>
    %cst_60 = arith.constant dense<0.000000e+00> : vector<16x128xf32>
    %123 = tpu.matmul %106, %107, %cst_60 {dimension_numbers = #tpu.dot_dimension_numbers<[1], [0], [0], [1], [0, 0, 1, 1], [], []>} : vector<16x128xf32>, vector<128x128xf32>, vector<16x128xf32> -> vector<16x128xf32>
    %124 = vector.broadcast %113 : vector<1x128xf32> to vector<16x128xf32>
    %125 = arith.addf %123, %124 : vector<16x128xf32>
    %cst_61 = arith.constant 0.353553385 : f32
    %126 = vector.broadcast %cst_61 : f32 to vector<16x128xf32>
    %127 = arith.mulf %125, %126 : vector<16x128xf32>
    %cst_62 = arith.constant dense<0.000000e+00> : vector<16x128xf32>
    %128 = tpu.matmul %106, %108, %cst_62 {dimension_numbers = #tpu.dot_dimension_numbers<[1], [0], [0], [1], [0, 0, 1, 1], [], []>} : vector<16x128xf32>, vector<128x128xf32>, vector<16x128xf32> -> vector<16x128xf32>
    %129 = vector.broadcast %114 : vector<1x128xf32> to vector<16x128xf32>
    %130 = arith.addf %128, %129 : vector<16x128xf32>
    %cst_63 = arith.constant dense<0.000000e+00> : vector<16x128xf32>
    %131 = tpu.matmul %106, %109, %cst_63 {dimension_numbers = #tpu.dot_dimension_numbers<[1], [0], [0], [1], [0, 0, 1, 1], [], []>} : vector<16x128xf32>, vector<128x128xf32>, vector<16x128xf32> -> vector<16x128xf32>
    %132 = vector.broadcast %115 : vector<1x128xf32> to vector<16x128xf32>
    %133 = arith.addf %131, %132 : vector<16x128xf32>
    %134 = tpu.concatenate %127, %127, %127, %127 in 0 : vector<16x128xf32>, vector<16x128xf32>, vector<16x128xf32>, vector<16x128xf32> -> vector<64x128xf32>
    %135 = arith.mulf %134, %1 : vector<64x128xf32>
    %cst_64 = arith.constant dense<0.000000e+00> : vector<64x16xf32>
    %136 = tpu.matmul %135, %130, %cst_64 {dimension_numbers = #tpu.dot_dimension_numbers<[1], [1], [0], [0], [0, 0, 1, 0], [], []>} : vector<64x128xf32>, vector<16x128xf32>, vector<64x16xf32> -> vector<64x16xf32>
    %137 = arith.addf %136, %2 : vector<64x16xf32>
    %cst_65 = arith.constant dense<0xFF800000> : vector<64xf32>
    %138 = vector.multi_reduction <maximumf>, %137, %cst_65 [1] : vector<64x16xf32> to vector<64xf32>
    %139 = vector.shape_cast %138 : vector<64xf32> to vector<64x1xf32>
    %140 = vector.broadcast %139 : vector<64x1xf32> to vector<64x16xf32>
    %141 = arith.subf %137, %140 : vector<64x16xf32>
    %142 = math.exp %141 : vector<64x16xf32>
    %cst_66 = arith.constant dense<0.000000e+00> : vector<64xf32>
    %143 = vector.multi_reduction <add>, %142, %cst_66 [1] : vector<64x16xf32> to vector<64xf32>
    %144 = vector.shape_cast %143 : vector<64xf32> to vector<64x1xf32>
    %145 = tpu.reciprocal %144 {approx = true} : vector<64x1xf32> -> vector<64x1xf32>
    %146 = vector.broadcast %145 : vector<64x1xf32> to vector<64x16xf32>
    %147 = arith.mulf %142, %146 : vector<64x16xf32>
    %cst_67 = arith.constant dense<0.000000e+00> : vector<64x128xf32>
    %148 = tpu.matmul %147, %133, %cst_67 {dimension_numbers = #tpu.dot_dimension_numbers<[1], [0], [0], [1], [0, 0, 1, 1], [], []>} : vector<64x16xf32>, vector<16x128xf32>, vector<64x128xf32> -> vector<64x128xf32>
    %149 = arith.mulf %148, %1 : vector<64x128xf32>
    %cst_68 = arith.constant dense<0.000000e+00> : vector<16x128xf32>
    %150 = tpu.matmul %3, %149, %cst_68 {dimension_numbers = #tpu.dot_dimension_numbers<[1], [0], [0], [1], [0, 0, 1, 1], [], []>} : vector<16x64xf32>, vector<64x128xf32>, vector<16x128xf32> -> vector<16x128xf32>
    %cst_69 = arith.constant dense<0.000000e+00> : vector<16x128xf32>
    %151 = tpu.matmul %150, %110, %cst_69 {dimension_numbers = #tpu.dot_dimension_numbers<[1], [0], [0], [1], [0, 0, 1, 1], [], []>} : vector<16x128xf32>, vector<128x128xf32>, vector<16x128xf32> -> vector<16x128xf32>
    %152 = vector.broadcast %116 : vector<1x128xf32> to vector<16x128xf32>
    %153 = arith.addf %151, %152 : vector<16x128xf32>
    %154 = arith.addf %106, %153 : vector<16x128xf32>
    %cst_70 = arith.constant dense<0.000000e+00> : vector<16xf32>
    %155 = vector.multi_reduction <add>, %154, %cst_70 [1] : vector<16x128xf32> to vector<16xf32>
    %156 = vector.shape_cast %155 : vector<16xf32> to vector<16x1xf32>
    %cst_71 = arith.constant 3.125000e-02 : f32
    %157 = vector.broadcast %cst_71 : f32 to vector<16x1xf32>
    %158 = arith.mulf %156, %157 : vector<16x1xf32>
    %159 = arith.mulf %154, %154 : vector<16x128xf32>
    %cst_72 = arith.constant dense<0.000000e+00> : vector<16xf32>
    %160 = vector.multi_reduction <add>, %159, %cst_72 [1] : vector<16x128xf32> to vector<16xf32>
    %161 = vector.shape_cast %160 : vector<16xf32> to vector<16x1xf32>
    %cst_73 = arith.constant 3.125000e-02 : f32
    %162 = vector.broadcast %cst_73 : f32 to vector<16x1xf32>
    %163 = arith.mulf %161, %162 : vector<16x1xf32>
    %164 = arith.mulf %158, %158 : vector<16x1xf32>
    %165 = arith.subf %163, %164 : vector<16x1xf32>
    %cst_74 = arith.constant 9.99999974E-6 : f32
    %166 = vector.broadcast %cst_74 : f32 to vector<16x1xf32>
    %167 = arith.addf %165, %166 : vector<16x1xf32>
    %168 = math.rsqrt %167 : vector<16x1xf32>
    %169 = vector.broadcast %158 : vector<16x1xf32> to vector<16x128xf32>
    %170 = arith.subf %154, %169 : vector<16x128xf32>
    %171 = vector.broadcast %168 : vector<16x1xf32> to vector<16x128xf32>
    %172 = arith.mulf %170, %171 : vector<16x128xf32>
    %173 = vector.broadcast %119 : vector<1x128xf32> to vector<16x128xf32>
    %174 = arith.mulf %172, %173 : vector<16x128xf32>
    %175 = vector.broadcast %120 : vector<1x128xf32> to vector<16x128xf32>
    %176 = arith.addf %174, %175 : vector<16x128xf32>
    %cst_75 = arith.constant dense<0.000000e+00> : vector<16x128xf32>
    %177 = tpu.matmul %176, %111, %cst_75 {dimension_numbers = #tpu.dot_dimension_numbers<[1], [0], [0], [1], [0, 0, 1, 1], [], []>} : vector<16x128xf32>, vector<128x128xf32>, vector<16x128xf32> -> vector<16x128xf32>
    %178 = vector.broadcast %117 : vector<1x128xf32> to vector<16x128xf32>
    %179 = arith.addf %177, %178 : vector<16x128xf32>
    %cst_76 = arith.constant 0.000000e+00 : f32
    %180 = vector.broadcast %cst_76 : f32 to vector<16x128xf32>
    %181 = arith.maximumf %179, %180 : vector<16x128xf32>
    %cst_77 = arith.constant dense<0.000000e+00> : vector<16x128xf32>
    %182 = tpu.matmul %181, %112, %cst_77 {dimension_numbers = #tpu.dot_dimension_numbers<[1], [0], [0], [1], [0, 0, 1, 1], [], []>} : vector<16x128xf32>, vector<128x128xf32>, vector<16x128xf32> -> vector<16x128xf32>
    %183 = vector.broadcast %118 : vector<1x128xf32> to vector<16x128xf32>
    %184 = arith.addf %182, %183 : vector<16x128xf32>
    %185 = arith.addf %176, %184 : vector<16x128xf32>
    %cst_78 = arith.constant dense<0.000000e+00> : vector<16xf32>
    %186 = vector.multi_reduction <add>, %185, %cst_78 [1] : vector<16x128xf32> to vector<16xf32>
    %187 = vector.shape_cast %186 : vector<16xf32> to vector<16x1xf32>
    %cst_79 = arith.constant 3.125000e-02 : f32
    %188 = vector.broadcast %cst_79 : f32 to vector<16x1xf32>
    %189 = arith.mulf %187, %188 : vector<16x1xf32>
    %190 = arith.mulf %185, %185 : vector<16x128xf32>
    %cst_80 = arith.constant dense<0.000000e+00> : vector<16xf32>
    %191 = vector.multi_reduction <add>, %190, %cst_80 [1] : vector<16x128xf32> to vector<16xf32>
    %192 = vector.shape_cast %191 : vector<16xf32> to vector<16x1xf32>
    %cst_81 = arith.constant 3.125000e-02 : f32
    %193 = vector.broadcast %cst_81 : f32 to vector<16x1xf32>
    %194 = arith.mulf %192, %193 : vector<16x1xf32>
    %195 = arith.mulf %189, %189 : vector<16x1xf32>
    %196 = arith.subf %194, %195 : vector<16x1xf32>
    %cst_82 = arith.constant 9.99999974E-6 : f32
    %197 = vector.broadcast %cst_82 : f32 to vector<16x1xf32>
    %198 = arith.addf %196, %197 : vector<16x1xf32>
    %199 = math.rsqrt %198 : vector<16x1xf32>
    %200 = vector.broadcast %189 : vector<16x1xf32> to vector<16x128xf32>
    %201 = arith.subf %185, %200 : vector<16x128xf32>
    %202 = vector.broadcast %199 : vector<16x1xf32> to vector<16x128xf32>
    %203 = arith.mulf %201, %202 : vector<16x128xf32>
    %204 = vector.broadcast %121 : vector<1x128xf32> to vector<16x128xf32>
    %205 = arith.mulf %203, %204 : vector<16x128xf32>
    %206 = vector.broadcast %122 : vector<1x128xf32> to vector<16x128xf32>
    %207 = arith.addf %205, %206 : vector<16x128xf32>
    %c1728 = arith.constant 1728 : index
    %c0_83 = arith.constant 0 : index
    %208 = vector.load %arg1[%c1728, %c0_83] : memref<1864x128xf32, #tpu.memory_space<vmem>>, vector<128x128xf32>
    %c1856 = arith.constant 1856 : index
    %c0_84 = arith.constant 0 : index
    %209 = vector.load %arg1[%c1856, %c0_84] : memref<1864x128xf32, #tpu.memory_space<vmem>>, vector<1x128xf32>
    %210 = vector.extract_strided_slice %207 {offsets = [14, 0], sizes = [2, 128], strides = [1, 1]} : vector<16x128xf32> to vector<2x128xf32>
    %cst_85 = arith.constant dense<0.000000e+00> : vector<2x128xf32>
    %211 = tpu.matmul %210, %208, %cst_85 {dimension_numbers = #tpu.dot_dimension_numbers<[1], [0], [0], [1], [0, 0, 1, 1], [], []>} : vector<2x128xf32>, vector<128x128xf32>, vector<2x128xf32> -> vector<2x128xf32>
    %212 = vector.broadcast %209 : vector<1x128xf32> to vector<2x128xf32>
    %213 = arith.addf %211, %212 : vector<2x128xf32>
    %c0_86 = arith.constant 0 : index
    %c0_87 = arith.constant 0 : index
    %214 = vector.load %arg2[%c0_86, %c0_87] : memref<2x128xf32, #tpu.memory_space<vmem>>, vector<2x128xf32>
    tpu.vector_store %arg2[%c0_86, %c0_87], %213 {strides = array<i32>} : memref<2x128xf32, #tpu.memory_space<vmem>>, vector<2x128xf32>,
    return
  }
}

</mosaic_0001>

<bundles_post_ra>
// kernel: forward.1
= control target key start
LH: loop header
LB: loop body
LE: loop exit
PB: predicated region body
PF: predicated region fallthrough
CT: control target
= control target key end

     0   :  { %7 = vsyncpa [#allocation3], 0  ;;  %s4034_s0 = inlined_call_operand.vmem [shape: f32[16,128], index: 0, kind: input, shape index: {}]   ;;  %s4035_s1 = inlined_call_operand.hbm [shape: f32[1864,128], index: 1, kind: input, shape index: {}]   ;;  %s4036_s2 = inlined_call_operand.hbm [shape: f32[2,128], index: 2, kind: output, shape index: {}]  }
   0x1   :  { %8 = vsyncpa [#allocation4], 0  ;;  %s3802_s9 = smov [#allocation2]   ;;  %s3754_s13 = scalar_lea.hbm %s4035_s1, 29824 }
   0x2   :  { %s16_s10 = sshll.u32 %s3802_s9, 4  ;;  %p3755_p0 = scmp.ne.s32.totalorder %s4035_s1, %s3754_s13  ;;  %s17_s10 = int_to_ptr.vmem [resolvable:$true] %s16_s10 }
   0x3   :  { %p3758_p1 = scmp.lt.u32.totalorder %s3754_s13, %s4035_s1 }
   0x5   :  { %p3760_p2 = pnand %p3758_p1, %p3755_p0 }
   0x7   :  { %3763 = shalt.err (!%p3760_p2)
}
   0x8   :  { %s3764_s18 = scalar_lea.vmem %s17_s10, 29824  ;;  %p3769_p4 = scmp.lt.s32.totalorder %s17_s10, %s17_s10 }
   0x9   :  { %p3765_p3 = scmp.ne.s32.totalorder %s17_s10, %s3764_s18  ;;  %p3770_p5 = scmp.lt.s32.totalorder %s3764_s18, %s3764_s18 }
   0xb   :  { %p3771_p6 = por %p3770_p5, %p3769_p4 }
   0xd   :  { %p3772_p7 = pnand %p3771_p6, %p3765_p3 }
   0xf   :  { %3775 = shalt.err (!%p3772_p7)
}
  0x10   :  { %s3803_s19 = smov 128   ;;  %s3804_s20 = smov 8  }
  0x11   :  { %22 = dma.hbm_to_vmem [thread:$0]  %s4035_s1, 29824, %s17_s10, [#allocation3], %s3803_s19, %s3803_s19, %s3804_s20  }
  0x12   :  { %3798 = dma.done.wait [#allocation3], 29824  }
  0x13   :  { %3799 = vsyncadd [#allocation3], 4294937472  ;;  %v66_v0 = vld [vmem:[#allocation2 + $0x120] sm:$0xff]  ;;  %v67_v1 = vld [vmem:[#allocation2 + $0x128] sm:$0xff]  ;;  %vm508_vm0 = vcmask 130048   ;;  %vm734_vm1 = vcmask 523264  }
  0x14   :  { %v50_v2 = vld [vmem:[#allocation2 + $0xa0] sm:$0xff]  ;;  %v3228_v3 = vpack.c.bf16 %v67_v1, %v66_v0  ;;  %v51_v4 = vld [vmem:[#allocation2 + $0xa8] sm:$0xff]  ;;  %v68_v5 = vld [vmem:[#allocation2 + $0x130] sm:$0xff]  ;;  %vm3806_vm2 = vmmov 0  }
  0x15   :  { %v69_v6 = vld [vmem:[#allocation2 + $0x138] sm:$0xff]  ;;  %v3196_v7 = vpack.c.bf16 %v51_v4, %v50_v2  ;;  %v52_v9 = vld [vmem:[#allocation2 + $0xb0] sm:$0xff]  ;;  %v70_v11 = vld [vmem:[#allocation2 + $0x140] sm:$0xff] }
  0x16   :  { %v3232_v8 = vpack.c.bf16 %v69_v6, %v68_v5  ;;  %v53_v10 = vld [vmem:[#allocation2 + $0xb8] sm:$0xff]  ;;  %3229 = vmatprep.subr.bf16.mxu1 %v3228_v3  ;;  %v71_v13 = vld [vmem:[#allocation2 + $0x148] sm:$0xff]  ;;  %v54_v14 = vld [vmem:[#allocation2 + $0xc0] sm:$0xff] }
  0x17   :  { %v3200_v12 = vpack.c.bf16 %v53_v10, %v52_v9  ;;  %v55_v15 = vld [vmem:[#allocation2 + $0xc8] sm:$0xff]  ;;  %3231 = vmatpush3.bf16.msra.mxu1 %v3228_v3  ;;  %3197 = vmatprep.subr.bf16.mxu0 %v3196_v7  ;;  %v3236_v16 = vpack.c.bf16 %v71_v13, %v70_v11  ;;  %v72_v18 = vld [vmem:[#allocation2 + $0x150] sm:$0xff]  ;;  %v73_v19 = vld [vmem:[#allocation2 + $0x158] sm:$0xff] }
  0x18   :  { %3233 = vmatprep.subr.bf16.mxu1 %v3232_v8  ;;  %3199 = vmatpush3.bf16.msra.mxu0 %v3196_v7  ;;  %v3204_v17 = vpack.c.bf16 %v55_v15, %v54_v14  ;;  %v56_v20 = vld [vmem:[#allocation2 + $0xd0] sm:$0xff]  ;;  %v57_v21 = vld [vmem:[#allocation2 + $0xd8] sm:$0xff]  ;;  %v3240_v22 = vpack.c.bf16 %v73_v19, %v72_v18  ;;  %v74_v23 = vld [vmem:[#allocation2 + $0x160] sm:$0xff] }
  0x19   :  { %3201 = vmatprep.subr.bf16.mxu0 %v3200_v12  ;;  %v3208_v24 = vpack.c.bf16 %v57_v21, %v56_v20  ;;  %v75_v25 = vld [vmem:[#allocation2 + $0x168] sm:$0xff]  ;;  %v26_v26 = vld [vmem:[#allocation2] sm:$0xff]  ;;  %v76_v33 = vld [vmem:[#allocation2 + $0x170] sm:$0xff] }
  0x1a   :  { %v46_v27 = vld [vmem:[%s4034_s0] sm:$0xff]  ;;  %v59_v29 = vld [vmem:[#allocation2 + $0xe8] sm:$0xff]  ;;  %v3244_v31 = vpack.c.bf16 %v75_v25, %v74_v23  ;;  %v77_v34 = vld [vmem:[#allocation2 + $0x178] sm:$0xff] }
  0x1b   :  { %3235 = vmatpush3.bf16.msra.mxu1 %v3232_v8  ;;  %v58_v28 = vld [vmem:[#allocation2 + $0xe0] sm:$0xff]  ;;  %v3839_v30 = vadd.f32 %v46_v27, %v26_v26  ;;  %v60_v35 = vld [vmem:[#allocation2 + $0xf0] sm:$0xff]  ;;  %v61_v36 = vld [vmem:[#allocation2 + $0xf8] sm:$0xff]  ;;  %v3248_v37 = vpack.c.bf16 %v77_v34, %v76_v33 }
  0x1c   :  { %3237 = vmatprep.subr.bf16.mxu1 %v3236_v16  ;;  %3203 = vmatpush3.bf16.msra.mxu0 %v3200_v12  ;;  %v3212_v32 = vpack.c.bf16 %v59_v29, %v58_v28  ;;  %v3216_v38 = vpack.c.bf16 %v61_v36, %v60_v35  ;;  %v78_v39 = vld [vmem:[#allocation2 + $0x180] sm:$0xff]  ;;  %v79_v40 = vld [vmem:[#allocation2 + $0x188] sm:$0xff]  ;;  %v80_v45 = vld [vmem:[#allocation2 + $0x190] sm:$0xff] }
  0x1d   :  { %3205 = vmatprep.subr.bf16.mxu0 %v3204_v17  ;;  %2706 = vmatprep.mubr.f32.mxu1 %v3839_v30  ;;  %v62_v41 = vld [vmem:[#allocation2 + $0x100] sm:$0xff]  ;;  %v63_v42 = vld [vmem:[#allocation2 + $0x108] sm:$0xff]  ;;  %v3252_v43 = vpack.c.bf16 %v79_v40, %v78_v39  ;;  %v81_v46 = vld [vmem:[#allocation2 + $0x198] sm:$0xff] }
  0x1e   :  { %2671 = vmatprep.mubr.f32.mxu0 %v3839_v30  ;;  %v3220_v44 = vpack.c.bf16 %v63_v42, %v62_v41  ;;  %v64_v47 = vld [vmem:[#allocation2 + $0x110] sm:$0xff]  ;;  %v65_v48 = vld [vmem:[#allocation2 + $0x118] sm:$0xff]  ;;  %v3256_v49 = vpack.c.bf16 %v81_v46, %v80_v45  ;;  %v27_v51 = vld [vmem:[#allocation2 + $0x8] sm:$0xff] }
  0x1f   :  { %3239 = vmatpush3.bf16.msra.mxu1 %v3236_v16  ;;  %v3224_v50 = vpack.c.bf16 %v65_v48, %v64_v47  ;;  %v47_v52 = vld [vmem:[%s4034_s0 + $0x8] sm:$0xff]  ;;  %v2306_v54 = vld [vmem:[#allocation2 + $0x3a1] ss:$0 sm:$0xff]  ;;  %v2305_v56 = vld [vmem:[#allocation2 + $0x3a0] ss:$0 sm:$0xff]  ;;  %s3808_s0 = smov [#allocation5]  }
  0x20   :  { %3241 = vmatprep.subr.bf16.mxu1 %v3240_v22  ;;  %3207 = vmatpush3.bf16.msra.mxu0 %v3204_v17  ;;  %v3846_v53 = vadd.f32 %v47_v52, %v27_v51  ;;  %v3851_v1 = vld [vmem:[#allocation2 + $0x10] sm:$0xff]  ;;  %v3854_v5 = vld [vmem:[#allocation2 + $0x18] sm:$0xff]  ;;  %v3856_v6 = vld [vmem:[#allocation2 + $0x20] sm:$0xff]  ;;  %s2296_s26 = sshll.u32 %s3808_s0, 4  ;;  %s2297_s26 = int_to_ptr.vmem [resolvable:$true] %s2296_s26 }
  0x21   :  { %3209 = vmatprep.subr.bf16.mxu0 %v3208_v24  ;;  %v3860_v9 = vld [vmem:[#allocation2 + $0x28] sm:$0xff]  ;;  %v3862_v10 = vld [vmem:[#allocation2 + $0x30] sm:$0xff]  ;;  %v3866_v13 = vld [vmem:[#allocation2 + $0x38] sm:$0xff]  ;;  %s3776_s27 = scalar_lea.vmem %s2297_s26, 32  ;;  %p3781_p9 = scmp.lt.s32.totalorder %s2297_s26, %s2297_s26 }
  0x22   :  { %v3868_v14 = vld [vmem:[#allocation2 + $0x40] sm:$0xff]  ;;  %v3872_v17 = vld [vmem:[#allocation2 + $0x48] sm:$0xff]  ;;  %v84_v21 = vld [vmem:[#allocation2 + $0x1b0] sm:$0xff]  ;;  %p3777_p8 = scmp.ne.s32.totalorder %s2297_s26, %s3776_s27  ;;  %p3782_p10 = scmp.lt.s32.totalorder %s3776_s27, %s3776_s27 }
  0x23   :  { %3243 = vmatpush3.bf16.msra.mxu1 %v3240_v22  ;;  %v82_v19 = vld [vmem:[#allocation2 + $0x1a0] sm:$0xff]  ;;  %v83_v20 = vld [vmem:[#allocation2 + $0x1a8] sm:$0xff]  ;;  %v85_v23 = vld [vmem:[#allocation2 + $0x1b8] sm:$0xff] }
  0x24   :  { %3245 = vmatprep.subr.bf16.mxu1 %v3244_v31  ;;  %3211 = vmatpush3.bf16.msra.mxu0 %v3208_v24  ;;  %v3260_v22 = vpack.c.bf16 %v83_v20, %v82_v19  ;;  %v3264_v24 = vpack.c.bf16 %v85_v23, %v84_v21  ;;  %v86_v25 = vld [vmem:[#allocation2 + $0x1c0] sm:$0xff]  ;;  %v87_v26 = vld [vmem:[#allocation2 + $0x1c8] sm:$0xff]  ;;  %v88_v28 = vld [vmem:[#allocation2 + $0x1d0] sm:$0xff]  ;;  %p3783_p11 = por %p3782_p10, %p3781_p9 }
  0x25   :  { %3213 = vmatprep.subr.bf16.mxu0 %v3212_v32  ;;  %v3268_v27 = vpack.c.bf16 %v87_v26, %v86_v25  ;;  %v89_v29 = vld [vmem:[#allocation2 + $0x1d8] sm:$0xff]  ;;  %v91_v33 = vld [vmem:[#allocation2 + $0x1e8] sm:$0xff]  ;;  %v92_v35 = vld [vmem:[#allocation2 + $0x1f0] sm:$0xff] }
  0x26   :  { %v93_v36 = vld [vmem:[#allocation2 + $0x1f8] sm:$0xff]  ;;  %v95_v39 = vld [vmem:[#allocation2 + $0x208] sm:$0xff]  ;;  %v96_v41 = vld [vmem:[#allocation2 + $0x210] sm:$0xff]  ;;  %p3784_p12 = pnand %p3783_p11, %p3777_p8 }
  0x27   :  { %3247 = vmatpush3.bf16.msra.mxu1 %v3244_v31  ;;  %v3272_v31 = vpack.c.bf16 %v89_v29, %v88_v28  ;;  %v97_v42 = vld [vmem:[#allocation2 + $0x218] sm:$0xff]  ;;  %v2307_v21 = vld [vmem:[#allocation2 + $0x3a2] ss:$0 sm:$0xff] }
  0x28   :  { %3249 = vmatprep.subr.bf16.mxu1 %v3248_v37  ;;  %3215 = vmatpush3.bf16.msra.mxu0 %v3212_v32  ;;  %v90_v32 = vld [vmem:[#allocation2 + $0x1e0] sm:$0xff]  ;;  %v37_v46 = vld [vmem:[#allocation2 + $0x58] sm:$0xff] }
  0x29   :  { %3217 = vmatprep.subr.bf16.mxu0 %v3216_v38  ;;  %v3276_v34 = vpack.c.bf16 %v91_v33, %v90_v32 }
  0x2b   :  { %3251 = vmatpush3.bf16.msra.mxu1 %v3248_v37  ;;  %v3280_v37 = vpack.c.bf16 %v93_v36, %v92_v35 }
  0x2c   :  { %3253 = vmatprep.subr.bf16.mxu1 %v3252_v43  ;;  %3219 = vmatpush3.bf16.msra.mxu0 %v3216_v38  ;;  %v94_v38 = vld [vmem:[#allocation2 + $0x200] sm:$0xff] }
  0x2d   :  { %3221 = vmatprep.subr.bf16.mxu0 %v3220_v44  ;;  %v3284_v40 = vpack.c.bf16 %v95_v39, %v94_v38 }
  0x2f   :  { %3255 = vmatpush3.bf16.msra.mxu1 %v3252_v43  ;;  %v3288_v43 = vpack.c.bf16 %v97_v42, %v96_v41 }
  0x30   :  { %3257 = vmatprep.subr.bf16.mxu1 %v3256_v49  ;;  %3223 = vmatpush3.bf16.msra.mxu0 %v3220_v44  ;;  %v36_v44 = vld [vmem:[#allocation2 + $0x50] sm:$0xff] }
  0x31   :  { %3225 = vmatprep.subr.bf16.mxu0 %v3224_v50 }
  0x33   :  { %3259 = vmatpush3.bf16.msra.mxu1 %v3256_v49  ;;  %v38_v49 = vld [vmem:[#allocation2 + $0x60] sm:$0xff] }
  0x34   :  { %3227 = vmatpush3.bf16.msra.mxu0 %v3224_v50 }
  0x35   :  { %3261 = vmatprep.subr.bf16.mxu0 %v3260_v22 }
  0x36   :  { %2707 = vmatmul.mubr.f32.vlgmr.msra.gmra.mrb[0].mxu1 %v3846_v53 }
  0x37   :  { %2672 = vmatmul.mubr.f32.vlgmr.msra.gmra.mrb[0].mxu0 %v3846_v53 }
  0x38   :  { %2741 = vmatprep.mubr.f32.mxu0 %v3839_v30  ;;  %3263 = vmatpush3.bf16.msra.mxu0 %v3260_v22 }
  0x39   :  { %3265 = vmatprep.subr.bf16.mxu0 %v3264_v24 }
  0x3c   :  { %3267 = vmatpush3.bf16.msra.mxu0 %v3264_v24 }
  0x3d   :  { %3269 = vmatprep.subr.bf16.mxu0 %v3268_v27 }
  0x40   :  { %3271 = vmatpush3.bf16.msra.mxu0 %v3268_v27 }
  0x41   :  { %3273 = vmatprep.subr.bf16.mxu0 %v3272_v31 }
  0x44   :  { %3275 = vmatpush3.bf16.msra.mxu0 %v3272_v31 }
  0x45   :  { %3277 = vmatprep.subr.bf16.mxu0 %v3276_v34 }
  0x48   :  { %3279 = vmatpush3.bf16.msra.mxu0 %v3276_v34 }
  0x49   :  { %3281 = vmatprep.subr.bf16.mxu0 %v3280_v37 }
  0x4c   :  { %3283 = vmatpush3.bf16.msra.mxu0 %v3280_v37 }
  0x4d   :  { %3285 = vmatprep.subr.bf16.mxu0 %v3284_v40 }
  0x50   :  { %3287 = vmatpush3.bf16.msra.mxu0 %v3284_v40 }
  0x51   :  { %3289 = vmatprep.subr.bf16.mxu0 %v3288_v43 }
  0x54   :  { %3291 = vmatpush3.bf16.msra.mxu0 %v3288_v43 }
  0x57   :  { %2742 = vmatmul.mubr.f32.vlgmr.msra.gmra.mrb[2].mxu0 %v3846_v53 }
 0x109   :  { %v2708_v55 = vpop.f32.mrb[0].mxu1 }
 0x10a   :  { %v313_v57 = vadd.f32 %v2708_v55, %v2306_v54  ;;  %v307_v58 = vpop.f32.mrb[1].mxu1  ;;  %v2673_v59 = vpop.f32.mrb[0].mxu0 }
 0x10b   :  { %v308_v60 = vadd.f32 %v2306_v54, %v307_v58  ;;  %v226_v61 = vpop.f32.mrb[1].mxu0  ;;  %v232_v0 = vadd.f32 %v2673_v59, %v2305_v56  ;;  %v39_v54 = vld [vmem:[#allocation2 + $0x68] sm:$0xff] }
 0x10c   :  { %v227_v62 = vadd.f32 %v2305_v56, %v226_v61 }
 0x10d   :  { %v3292_v63 = vpack.c.bf16 %v313_v57, %v308_v60  ;;  %v236_v4 = vmul.f32 0.35355338, %v232_v0  ;;  %v40_v57 = vld [vmem:[#allocation2 + $0x70] sm:$0xff] }
 0x10e   :  { %v235_v2 = vmul.f32 0.35355338, %v227_v62  ;;  %v41_v62 = vld [vmem:[#allocation2 + $0x78] sm:$0xff] }
 0x10f   :  { %3293 = vmatprep.subr.bf16.mxu1 %v3292_v63  ;;  %v396_v7 = vmul.f32 %v236_v4, %v3854_v5  ;;  %v398_v11 = vmul.f32 %v236_v4, %v3860_v9  ;;  %v400_v15 = vmul.f32 %v236_v4, %v3866_v13  ;;  %v402_v18 = vmul.f32 %v236_v4, %v3872_v17 }
 0x110   :  { %3295 = vmatpush3.bf16.xpose.msra.mxu1 %v3292_v63  ;;  %v395_v3 = vmul.f32 %v235_v2, %v3851_v1  ;;  %v397_v8 = vmul.f32 %v235_v2, %v3856_v6  ;;  %v399_v12 = vmul.f32 %v235_v2, %v3862_v10  ;;  %v401_v16 = vmul.f32 %v235_v2, %v3868_v14  ;;  %v42_v2 = vld [vmem:[#allocation2 + $0x80] sm:$0xff] }
 0x112   :  { %2748 = vmatprep.mubr.f32.mxu1 %v395_v3 }
 0x117   :  { %2749 = vmatmul.mubr.f32.vlgmr.msra.gmra.mrb[2].mxu1 %v396_v7 }
 0x118   :  { %2751 = vmatprep.mubr.f32.mxu1 %v397_v8 }
 0x11b   :  { %2752 = vmatmul.mubr.f32.gmra.mrb[4].mxu1 %v398_v11  ;;  %v43_v11 = vld [vmem:[#allocation2 + $0x88] sm:$0xff] }
 0x11c   :  { %2754 = vmatprep.mubr.f32.mxu1 %v399_v12 }
 0x11f   :  { %2755 = vmatmul.mubr.f32.gmra.mrb[6].mxu1 %v400_v15 }
 0x120   :  { %2757 = vmatprep.mubr.f32.mxu1 %v401_v16 }
 0x123   :  { %2758 = vmatmul.mubr.f32.gmra.mrb[8].mxu1 %v402_v18 }
 0x12a   :  { %v2743_v22 = vpop.f32.mrb[2].mxu0 }
 0x12b   :  { %v392_v23 = vadd.f32 %v2743_v22, %v2307_v21  ;;  %v386_v24 = vpop.f32.mrb[3].mxu0 }
 0x12c   :  { %v387_v25 = vadd.f32 %v2307_v21, %v386_v24 }
 0x12e   :  { %v3296_v26 = vpack.c.bf16 %v392_v23, %v387_v25 }
 0x130   :  { %3297 = vmatprep.subr.bf16.mxu1 %v3296_v26 }
 0x131   :  { %3299 = vmatpush3.bf16.msra.mxu1 %v3296_v26 }
 0x1ea   :  { %v2750_v45 = vpop.f32.mrb[2].mxu1 }
 0x1eb   :  { %v469_v47 = vpop.f32.mrb[3].mxu1  ;;  %v475_v50 = vadd.f32 %v2750_v45, %v37_v46 }
 0x1ec   :  { %v470_v48 = vadd.f32 %v469_v47, %v36_v44 }
 0x1ed   :  { %v512_v61 = vsel %vm508_vm0, %v475_v50, -inf }
 0x1ee   :  { %v2753_v51 = vpop.f32.mrb[4].mxu1  ;;  %v509_v52 = vsel %vm508_vm0, %v470_v48, -inf }
 0x1ef   :  { %v479_v55 = vpop.f32.mrb[5].mxu1  ;;  %510 = vmax.xlane.f32.xlu0 %v509_v52  ;;  %v485_v58 = vadd.f32 %v2753_v51, %v39_v54 }
 0x1f0   :  { %v480_v56 = vadd.f32 %v479_v55, %v38_v49 }
 0x1f1   :  { %v518_v7 = vsel %vm508_vm0, %v485_v58, -inf }
 0x1f2   :  { %v2756_v59 = vpop.f32.mrb[6].mxu1  ;;  %v515_v60 = vsel %vm508_vm0, %v480_v56, -inf }
 0x1f3   :  { %v489_v63 = vpop.f32.mrb[7].mxu1  ;;  %516 = vmax.xlane.f32.xlu1 %v515_v60  ;;  %513 = vmax.xlane.f32.xlu0 %v512_v61  ;;  %v495_v3 = vadd.f32 %v2756_v59, %v41_v62 }
 0x1f4   :  { %v490_v0 = vadd.f32 %v489_v63, %v40_v57 }
 0x1f5   :  { %v524_v18 = vsel %vm508_vm0, %v495_v3, -inf }
 0x1f6   :  { %v2759_v4 = vpop.f32.mrb[8].mxu1  ;;  %v521_v8 = vsel %vm508_vm0, %v490_v0, -inf }
 0x1f7   :  { %v499_v12 = vpop.f32.mrb[9].mxu1  ;;  %519 = vmax.xlane.f32.xlu1 %v518_v7  ;;  %522 = vmax.xlane.f32.xlu0 %v521_v8  ;;  %v505_v16 = vadd.f32 %v2759_v4, %v43_v11 }
 0x1f8   :  { %v500_v15 = vadd.f32 %v499_v12, %v42_v2 }
 0x1f9   :  { %v530_v20 = vsel %vm508_vm0, %v505_v16, -inf }
 0x1fa   :  { %v527_v19 = vsel %vm508_vm0, %v500_v15, -inf }
 0x1fb   :  { %525 = vmax.xlane.f32.xlu1 %v524_v18  ;;  %528 = vmax.xlane.f32.xlu0 %v527_v19 }
 0x1ff   :  { %531 = vmax.xlane.f32.xlu1 %v530_v20 }
 0x27c   :  { %v511_v27 = vpop.xlane.xlu0 %510 }
 0x27d   :  { %v533_v28 = vsub.f32 %v470_v48, %v511_v27 }
 0x27f   :  { %v541_v29 = vmul.f32 1.442695, %v533_v28 }
 0x280   :  { %v517_v31 = vpop.xlane.xlu1 %516  ;;  %v514_v32 = vpop.xlane.xlu0 %513 }
 0x281   :  { %3659 = vpow2.f32 %v541_v29  ;;  %v535_v33 = vsub.f32 %v480_v56, %v517_v31  ;;  %v534_v34 = vsub.f32 %v475_v50, %v514_v32 }
 0x283   :  { %v545_v35 = vmul.f32 1.442695, %v535_v33  ;;  %v543_v36 = vmul.f32 1.442695, %v534_v34 }
 0x284   :  { %v520_v37 = vpop.xlane.xlu1 %519  ;;  %v523_v38 = vpop.xlane.xlu0 %522 }
 0x285   :  { %3661 = vpow2.f32 %v545_v35  ;;  %v536_v39 = vsub.f32 %v485_v58, %v520_v37  ;;  %v537_v40 = vsub.f32 %v490_v0, %v523_v38  ;;  %v3900_v38 = vld [vmem:[#allocation2 + $0x90] sm:$0xff] }
 0x286   :  { %3663 = vpow2.f32 %v543_v36 }
 0x287   :  { %v547_v41 = vmul.f32 1.442695, %v536_v39  ;;  %v549_v42 = vmul.f32 1.442695, %v537_v40  ;;  %v98_v39 = vld [vmem:[#allocation2 + $0x220] sm:$0xff]  ;;  %v99_v40 = vld [vmem:[#allocation2 + $0x228] sm:$0xff] }
 0x288   :  { %v526_v43 = vpop.xlane.xlu1 %525  ;;  %v529_v44 = vpop.xlane.xlu0 %528 }
 0x289   :  { %3665 = vpow2.f32 %v547_v41  ;;  %v538_v45 = vsub.f32 %v495_v3, %v526_v43  ;;  %v539_v46 = vsub.f32 %v500_v15, %v529_v44  ;;  %v100_v41 = vld [vmem:[#allocation2 + $0x230] sm:$0xff]  ;;  %v101_v43 = vld [vmem:[#allocation2 + $0x238] sm:$0xff] }
 0x28a   :  { %3667 = vpow2.f32 %v549_v42  ;;  %v3316_v42 = vpack.c.bf16 %v99_v40, %v98_v39  ;;  %v3320_v44 = vpack.c.bf16 %v101_v43, %v100_v41  ;;  %v120_v41 = vld [vmem:[#allocation2 + $0x2d0] sm:$0xff] }
 0x28b   :  { %v3660_v47 = vpop.eup %3659  ;;  %v551_v48 = vmul.f32 1.442695, %v538_v45  ;;  %v553_v49 = vmul.f32 1.442695, %v539_v46  ;;  %v102_v45 = vld [vmem:[#allocation2 + $0x240] sm:$0xff]  ;;  %v103_v46 = vld [vmem:[#allocation2 + $0x248] sm:$0xff] }
 0x28c   :  { %v532_v50 = vpop.xlane.xlu1 %531  ;;  %v557_v51 = vsel %vm508_vm0, %v3660_v47, 0.0  ;;  %3317 = vmatprep.subr.bf16.mxu0 %v3316_v42 }
 0x28d   :  { %3669 = vpow2.f32 %v551_v48  ;;  %v540_v52 = vsub.f32 %v505_v16, %v532_v50  ;;  %558 = vadd.xlane.f32.xlu0 %v557_v51  ;;  %3319 = vmatpush3.bf16.msra.mxu0 %v3316_v42  ;;  %v104_v48 = vld [vmem:[#allocation2 + $0x250] sm:$0xff]  ;;  %v106_v51 = vld [vmem:[#allocation2 + $0x260] sm:$0xff]  ;;  %v121_v42 = vld [vmem:[#allocation2 + $0x2d8] sm:$0xff] }
 0x28e   :  { %3671 = vpow2.f32 %v553_v49  ;;  %3321 = vmatprep.subr.bf16.mxu0 %v3320_v44  ;;  %v105_v49 = vld [vmem:[#allocation2 + $0x258] sm:$0xff]  ;;  %v3360_v43 = vpack.c.bf16 %v121_v42, %v120_v41  ;;  %v144_v42 = vld [vmem:[#allocation2 + $0x390] sm:$0xff] }
 0x28f   :  { %v3662_v54 = vpop.eup %3661  ;;  %v555_v55 = vmul.f32 1.442695, %v540_v52  ;;  %v3328_v50 = vpack.c.bf16 %v105_v49, %v104_v48  ;;  %v107_v52 = vld [vmem:[#allocation2 + $0x268] sm:$0xff]  ;;  %v125_v48 = vld [vmem:[#allocation2 + $0x2f8] sm:$0xff] }
 0x290   :  { %v3664_v56 = vpop.eup %3663  ;;  %v563_v57 = vsel %vm508_vm0, %v3662_v54, 0.0 }
 0x291   :  { %3673 = vpow2.f32 %v555_v55  ;;  %564 = vadd.xlane.f32.xlu0 %v563_v57  ;;  %v560_v58 = vsel %vm508_vm0, %v3664_v56, 0.0  ;;  %3323 = vmatpush3.bf16.msra.mxu0 %v3320_v44  ;;  %v108_v55 = vld [vmem:[#allocation2 + $0x270] sm:$0xff]  ;;  %v122_v44 = vld [vmem:[#allocation2 + $0x2e0] sm:$0xff] }
 0x292   :  { %561 = vadd.xlane.f32.xlu1 %v560_v58  ;;  %v110_v58 = vld [vmem:[#allocation2 + $0x280] sm:$0xff] }
 0x293   :  { %v3666_v59 = vpop.eup %3665 }
 0x294   :  { %v3668_v60 = vpop.eup %3667  ;;  %v566_v61 = vsel %vm508_vm0, %v3666_v59, 0.0 }
 0x295   :  { %v569_v62 = vsel %vm508_vm0, %v3668_v60, 0.0 }
 0x296   :  { %567 = vadd.xlane.f32.xlu1 %v566_v61  ;;  %570 = vadd.xlane.f32.xlu0 %v569_v62  ;;  %v112_v61 = vld [vmem:[#allocation2 + $0x290] sm:$0xff]  ;;  %v113_v62 = vld [vmem:[#allocation2 + $0x298] sm:$0xff] }
 0x297   :  { %v3670_v63 = vpop.eup %3669 }
 0x298   :  { %v3672_v0 = vpop.eup %3671  ;;  %v572_v2 = vsel %vm508_vm0, %v3670_v63, 0.0 }
 0x299   :  { %v575_v3 = vsel %vm508_vm0, %v3672_v0, 0.0 }
 0x29a   :  { %573 = vadd.xlane.f32.xlu1 %v572_v2  ;;  %576 = vadd.xlane.f32.xlu0 %v575_v3 }
 0x29b   :  { %v3674_v4 = vpop.eup %3673 }
 0x29c   :  { %v578_v7 = vsel %vm508_vm0, %v3674_v4, 0.0 }
 0x29e   :  { %579 = vadd.xlane.f32.xlu1 %v578_v7 }
 0x31a   :  { %v559_v8 = vpop.xlane.xlu0 %558 }
 0x31b   :  { %3675 = vrcp.f32 %v559_v8 }
 0x31e   :  { %v565_v11 = vpop.xlane.xlu0 %564 }
 0x31f   :  { %v562_v12 = vpop.xlane.xlu1 %561  ;;  %3677 = vrcp.f32 %v565_v11 }
 0x320   :  { %3679 = vrcp.f32 %v562_v12 }
 0x323   :  { %v568_v15 = vpop.xlane.xlu1 %567  ;;  %v571_v16 = vpop.xlane.xlu0 %570 }
 0x324   :  { %3681 = vrcp.f32 %v568_v15 }
 0x325   :  { %v3676_v18 = vpop.eup %3675  ;;  %3683 = vrcp.f32 %v571_v16 }
 0x326   :  { %v589_v19 = vmul.f32 %v3676_v18, %v3660_v47  ;;  %v3324_v47 = vpack.c.bf16 %v103_v46, %v102_v45  ;;  %v123_v45 = vld [vmem:[#allocation2 + $0x2e8] sm:$0xff]  ;;  %v124_v46 = vld [vmem:[#allocation2 + $0x2f0] sm:$0xff] }
 0x327   :  { %v574_v20 = vpop.xlane.xlu1 %573  ;;  %v577_v21 = vpop.xlane.xlu0 %576  ;;  %v3368_v49 = vpack.c.bf16 %v125_v48, %v124_v46 }
 0x328   :  { %3685 = vrcp.f32 %v574_v20  ;;  %2764 = vmatprep.mubr.msk.f32.mxu1 %vm508_vm0, %v589_v19  ;;  %3325 = vmatprep.subr.bf16.mxu0 %v3324_v47 }
 0x329   :  { %v3678_v22 = vpop.eup %3677  ;;  %3687 = vrcp.f32 %v577_v21  ;;  %3327 = vmatpush3.bf16.msra.mxu0 %v3324_v47  ;;  %v3364_v47 = vpack.c.bf16 %v123_v45, %v122_v44 }
 0x32a   :  { %v3680_v23 = vpop.eup %3679  ;;  %v591_v24 = vmul.f32 %v3678_v22, %v3662_v54  ;;  %3329 = vmatprep.subr.bf16.mxu0 %v3328_v50  ;;  %v3332_v54 = vpack.c.bf16 %v107_v52, %v106_v51  ;;  %v127_v51 = vld [vmem:[#allocation2 + $0x308] sm:$0xff] }
 0x32b   :  { %v590_v25 = vmul.f32 %v3680_v23, %v3664_v56  ;;  %v580_v26 = vpop.xlane.xlu1 %579  ;;  %v109_v56 = vld [vmem:[#allocation2 + $0x278] sm:$0xff] }
 0x32c   :  { %3689 = vrcp.f32 %v580_v26  ;;  %v3336_v57 = vpack.c.bf16 %v109_v56, %v108_v55  ;;  %v115_v26 = vld [vmem:[#allocation2 + $0x2a8] sm:$0xff]  ;;  %v129_v55 = vld [vmem:[#allocation2 + $0x318] sm:$0xff] }
 0x32d   :  { %2765 = vmatmul.mubr.msk.f32.vlgmr.msra.gmra.mrb[10].mxu1 %vm508_vm0, %v590_v25  ;;  %3331 = vmatpush3.bf16.msra.mxu0 %v3328_v50  ;;  %v126_v50 = vld [vmem:[#allocation2 + $0x300] sm:$0xff] }
 0x32e   :  { %v3682_v27 = vpop.eup %3681  ;;  %2767 = vmatprep.mubr.msk.f32.mxu1 %vm508_vm0, %v591_v24  ;;  %3333 = vmatprep.subr.bf16.mxu0 %v3332_v54  ;;  %v45_v24 = vld [vmem:[#allocation2 + $0x98] sm:$0xff]  ;;  %v3372_v52 = vpack.c.bf16 %v127_v51, %v126_v50  ;;  %v1135_v50 = vld [vmem:[#allocation2 + $0x3b0] sm:$0xff] }
 0x32f   :  { %v3684_v28 = vpop.eup %3683  ;;  %v592_v29 = vmul.f32 %v3682_v27, %v3666_v59  ;;  %v111_v59 = vld [vmem:[#allocation2 + $0x288] sm:$0xff]  ;;  %v1136_v51 = vld [vmem:[#allocation2 + $0x3b8] sm:$0xff] }
 0x330   :  { %v593_v31 = vmul.f32 %v3684_v28, %v3668_v60  ;;  %v3340_v60 = vpack.c.bf16 %v111_v59, %v110_v58  ;;  %v131_v58 = vld [vmem:[#allocation2 + $0x328] sm:$0xff]  ;;  %v132_v59 = vld [vmem:[#allocation2 + $0x330] sm:$0xff] }
 0x331   :  { %2768 = vmatmul.mubr.msk.f32.gmra.mrb[12].mxu1 %vm508_vm0, %v592_v29  ;;  %3335 = vmatpush3.bf16.msra.mxu0 %v3332_v54  ;;  %v128_v54 = vld [vmem:[#allocation2 + $0x310] sm:$0xff] }
 0x332   :  { %v3686_v32 = vpop.eup %3685  ;;  %2770 = vmatprep.mubr.msk.f32.mxu1 %vm508_vm0, %v593_v31  ;;  %3337 = vmatprep.subr.bf16.mxu0 %v3336_v57  ;;  %v3376_v56 = vpack.c.bf16 %v129_v55, %v128_v54  ;;  %v3412_v54 = vpack.c.bf16 %v1136_v51, %v1135_v50  ;;  %v1152_v55 = vld [vmem:[#allocation2 + $0x438] sm:$0xff] }
 0x333   :  { %v3688_v33 = vpop.eup %3687  ;;  %v594_v34 = vmul.f32 %v3686_v32, %v3670_v63  ;;  %v3344_v63 = vpack.c.bf16 %v113_v62, %v112_v61  ;;  %v133_v61 = vld [vmem:[#allocation2 + $0x338] sm:$0xff] }
 0x334   :  { %v595_v35 = vmul.f32 %v3688_v33, %v3672_v0  ;;  %v3384_v62 = vpack.c.bf16 %v133_v61, %v132_v59 }
 0x335   :  { %2771 = vmatmul.mubr.msk.f32.gmra.mrb[14].mxu1 %vm508_vm0, %v594_v34  ;;  %3339 = vmatpush3.bf16.msra.mxu0 %v3336_v57  ;;  %v130_v57 = vld [vmem:[#allocation2 + $0x320] sm:$0xff] }
 0x336   :  { %v3690_v36 = vpop.eup %3689  ;;  %2773 = vmatprep.mubr.msk.f32.mxu1 %vm508_vm0, %v595_v35  ;;  %3341 = vmatprep.subr.bf16.mxu0 %v3340_v60 }
 0x337   :  { %v596_v37 = vmul.f32 %v3690_v36, %v3674_v4  ;;  %v116_v36 = vld [vmem:[#allocation2 + $0x2b0] sm:$0xff] }
 0x339   :  { %2774 = vmatmul.mubr.msk.f32.gmra.mrb[16].mxu1 %vm508_vm0, %v596_v37  ;;  %3343 = vmatpush3.bf16.msra.mxu0 %v3340_v60  ;;  %v117_v37 = vld [vmem:[#allocation2 + $0x2b8] sm:$0xff]  ;;  %v3380_v60 = vpack.c.bf16 %v131_v58, %v130_v57  ;;  %v2322_v57 = vld [vmem:[#allocation2 + $0x3a5] ss:$0 sm:$0xff] }
 0x33a   :  { %2792 = vmatprep.mubr.msk.f32.mxu1 %vm734_vm1, %v3900_v38  ;;  %3345 = vmatprep.subr.bf16.mxu0 %v3344_v63  ;;  %v3352_v39 = vpack.c.bf16 %v117_v37, %v116_v36 }
 0x33d   :  { %3347 = vmatpush3.bf16.msra.mxu0 %v3344_v63  ;;  %v134_v63 = vld [vmem:[#allocation2 + $0x340] sm:$0xff] }
 0x33e   :  { %3381 = vmatprep.subr.bf16.mxu0 %v3380_v60 }
 0x400   :  { %v2766_v0 = vpop.f32.mrb[10].mxu1 }
 0x401   :  { %v727_v2 = vmul.f32 %v2766_v0, %v3854_v5  ;;  %v687_v3 = vpop.f32.mrb[11].mxu1  ;;  %v135_v0 = vld [vmem:[#allocation2 + $0x348] sm:$0xff] }
 0x402   :  { %v726_v4 = vmul.f32 %v687_v3, %v3851_v1  ;;  %v136_v3 = vld [vmem:[#allocation2 + $0x350] sm:$0xff] }
 0x404   :  { %v3300_v7 = vpack.c.bf16 %v727_v2, %v726_v4  ;;  %v2769_v8 = vpop.f32.mrb[12].mxu1  ;;  %v3388_v2 = vpack.c.bf16 %v135_v0, %v134_v63  ;;  %v137_v4 = vld [vmem:[#allocation2 + $0x358] sm:$0xff] }
 0x405   :  { %v729_v11 = vmul.f32 %v2769_v8, %v3860_v9  ;;  %v697_v12 = vpop.f32.mrb[13].mxu1  ;;  %v138_v8 = vld [vmem:[#allocation2 + $0x360] sm:$0xff] }
 0x406   :  { %v728_v15 = vmul.f32 %v697_v12, %v3856_v6  ;;  %3301 = vmatprep.subr.bf16.mxu1 %v3300_v7 }
 0x407   :  { %3303 = vmatpush3.bf16.msra.mxu1 %v3300_v7  ;;  %v3392_v7 = vpack.c.bf16 %v137_v4, %v136_v3  ;;  %v1137_v3 = vld [vmem:[#allocation2 + $0x3c0] sm:$0xff]  ;;  %v1138_v4 = vld [vmem:[#allocation2 + $0x3c8] sm:$0xff] }
 0x408   :  { %v3304_v16 = vpack.c.bf16 %v729_v11, %v728_v15  ;;  %v2772_v18 = vpop.f32.mrb[14].mxu1  ;;  %v139_v11 = vld [vmem:[#allocation2 + $0x368] sm:$0xff]  ;;  %v140_v15 = vld [vmem:[#allocation2 + $0x370] sm:$0xff] }
 0x409   :  { %v731_v19 = vmul.f32 %v2772_v18, %v3866_v13  ;;  %v707_v20 = vpop.f32.mrb[15].mxu1  ;;  %v3396_v12 = vpack.c.bf16 %v139_v11, %v138_v8  ;;  %v1153_v8 = vld [vmem:[#allocation2 + $0x440] sm:$0xff]  ;;  %v1154_v11 = vld [vmem:[#allocation2 + $0x448] sm:$0xff] }
 0x40a   :  { %v730_v21 = vmul.f32 %v707_v20, %v3862_v10  ;;  %3305 = vmatprep.subr.bf16.mxu1 %v3304_v16  ;;  %v114_v10 = vld [vmem:[#allocation2 + $0x2a0] sm:$0xff]  ;;  %v143_v20 = vld [vmem:[#allocation2 + $0x388] sm:$0xff] }
 0x40b   :  { %3307 = vmatpush3.bf16.msra.mxu1 %v3304_v16  ;;  %v3348_v27 = vpack.c.bf16 %v115_v26, %v114_v10  ;;  %v141_v16 = vld [vmem:[#allocation2 + $0x378] sm:$0xff] }
 0x40c   :  { %v3308_v5 = vpack.c.bf16 %v731_v19, %v730_v21  ;;  %v2775_v1 = vpop.f32.mrb[16].mxu1  ;;  %v3400_v18 = vpack.c.bf16 %v141_v16, %v140_v15  ;;  %v142_v19 = vld [vmem:[#allocation2 + $0x380] sm:$0xff]  ;;  %v1139_v15 = vld [vmem:[#allocation2 + $0x3d0] sm:$0xff]  ;;  %v1140_v16 = vld [vmem:[#allocation2 + $0x3d8] sm:$0xff] }
 0x40d   :  { %v733_v22 = vmul.f32 %v2775_v1, %v3872_v17  ;;  %v717_v23 = vpop.f32.mrb[17].mxu1  ;;  %v2318_v17 = vld [vmem:[#allocation2 + $0x3a3] ss:$0 sm:$0xff]  ;;  %v3404_v21 = vpack.c.bf16 %v143_v20, %v142_v19  ;;  %v1155_v19 = vld [vmem:[#allocation2 + $0x450] sm:$0xff]  ;;  %v1156_v20 = vld [vmem:[#allocation2 + $0x458] sm:$0xff] }
 0x40e   :  { %v732_v9 = vmul.f32 %v717_v23, %v3868_v14  ;;  %3309 = vmatprep.subr.bf16.mxu1 %v3308_v5 }
 0x40f   :  { %3311 = vmatpush3.bf16.msra.mxu1 %v3308_v5 }
 0x410   :  { %v3312_v6 = vpack.c.bf16 %v733_v22, %v732_v9 }
 0x412   :  { %3313 = vmatprep.subr.bf16.mxu1 %v3312_v6 }
 0x413   :  { %3315 = vmatpush3.bf16.msra.mxu1 %v3312_v6 }
 0x414   :  { %3349 = vmatprep.subr.bf16.mxu1 %v3348_v27 }
 0x416   :  { %2793 = vmatmul.mubr.msk.f32.vlgmr.msra.gmra.mrb[18].mxu1 %vm734_vm1, %v45_v24 }
 0x417   :  { %3351 = vmatpush3.bf16.msra.mxu1 %v3348_v27 }
 0x418   :  { %3353 = vmatprep.subr.bf16.mxu1 %v3352_v39 }
 0x41b   :  { %3355 = vmatpush3.bf16.msra.mxu1 %v3352_v39  ;;  %v2320_v39 = vld [vmem:[#allocation2 + $0x3a7] ss:$0 sm:$0xff] }
 0x4e9   :  { %v2794_v13 = vpop.f32.mrb[18].mxu1 }
 0x4ea   :  { %v807_v25 = vpop.f32.mrb[19].mxu1 }
 0x4eb   :  { %2827 = vmatprep.mubr.f32.mxu0 %v807_v25 }
 0x4ec   :  { %2828 = vmatmul.mubr.f32.vlgmr.msra.gmra.mrb[4].mxu0 %v2794_v13 }
 0x4ed   :  { %3383 = vmatpush3.bf16.msra.mxu0 %v3380_v60 }
 0x4ee   :  { %3385 = vmatprep.subr.bf16.mxu0 %v3384_v62 }
 0x4f1   :  { %3387 = vmatpush3.bf16.msra.mxu0 %v3384_v62 }
 0x4f2   :  { %3389 = vmatprep.subr.bf16.mxu0 %v3388_v2 }
 0x4f5   :  { %3391 = vmatpush3.bf16.msra.mxu0 %v3388_v2 }
 0x4f6   :  { %3393 = vmatprep.subr.bf16.mxu0 %v3392_v7 }
 0x4f9   :  { %3395 = vmatpush3.bf16.msra.mxu0 %v3392_v7  ;;  %v3416_v7 = vpack.c.bf16 %v1138_v4, %v1137_v3  ;;  %v2323_v4 = vld [vmem:[#allocation2 + $0x3a8] ss:$0 sm:$0xff] }
 0x4fa   :  { %3397 = vmatprep.subr.bf16.mxu0 %v3396_v12 }
 0x4fd   :  { %3399 = vmatpush3.bf16.msra.mxu0 %v3396_v12  ;;  %v3448_v12 = vpack.c.bf16 %v1154_v11, %v1153_v8 }
 0x4fe   :  { %3401 = vmatprep.subr.bf16.mxu0 %v3400_v18 }
 0x501   :  { %3403 = vmatpush3.bf16.msra.mxu0 %v3400_v18  ;;  %v3420_v18 = vpack.c.bf16 %v1140_v16, %v1139_v15 }
 0x502   :  { %3405 = vmatprep.subr.bf16.mxu0 %v3404_v21 }
 0x505   :  { %3407 = vmatpush3.bf16.msra.mxu0 %v3404_v21  ;;  %v3452_v21 = vpack.c.bf16 %v1156_v20, %v1155_v19  ;;  %v1170_v19 = vld [vmem:[#allocation2 + $0x4c8] sm:$0xff] }
 0x5bf   :  { %v2829_v28 = vpop.f32.mrb[4].mxu0 }
 0x5c0   :  { %v892_v14 = vadd.f32 %v2829_v28, %v2318_v17  ;;  %v886_v29 = vpop.f32.mrb[5].mxu0 }
 0x5c1   :  { %v887_v31 = vadd.f32 %v2318_v17, %v886_v29 }
 0x5c2   :  { %v3914_v32 = vadd.f32 %v892_v14, %v3846_v53  ;;  %v118_v53 = vld [vmem:[#allocation2 + $0x2c0] sm:$0xff] }
 0x5c3   :  { %v3917_v33 = vadd.f32 %v887_v31, %v3839_v30  ;;  %v119_v30 = vld [vmem:[#allocation2 + $0x2c8] sm:$0xff] }
 0x5c4   :  { %899 = vadd.xlane.f32.xlu1 %v3914_v32  ;;  %v904_v34 = vmul.f32 %v3914_v32, %v3914_v32  ;;  %v3356_v40 = vpack.c.bf16 %v119_v30, %v118_v53 }
 0x5c5   :  { %897 = vadd.xlane.f32.xlu0 %v3917_v33  ;;  %v903_v35 = vmul.f32 %v3917_v33, %v3917_v33 }
 0x5c6   :  { %3357 = vmatprep.subr.bf16.mxu1 %v3356_v40 }
 0x5c7   :  { %3359 = vmatpush3.bf16.msra.mxu1 %v3356_v40 }
 0x5c8   :  { %907 = vadd.xlane.f32.xlu1 %v904_v34  ;;  %3361 = vmatprep.subr.bf16.mxu1 %v3360_v43  ;;  %v2319_v34 = vld [vmem:[#allocation2 + $0x3a6] ss:$0 sm:$0xff] }
 0x5c9   :  { %905 = vadd.xlane.f32.xlu0 %v903_v35 }
 0x5cb   :  { %3363 = vmatpush3.bf16.msra.mxu1 %v3360_v43  ;;  %v145_v43 = vld [vmem:[#allocation2 + $0x398] sm:$0xff] }
 0x5cc   :  { %3365 = vmatprep.subr.bf16.mxu1 %v3364_v47  ;;  %v3408_v44 = vpack.c.bf16 %v145_v43, %v144_v42  ;;  %v1165_v42 = vld [vmem:[#allocation2 + $0x4a0] sm:$0xff]  ;;  %v1166_v43 = vld [vmem:[#allocation2 + $0x4a8] sm:$0xff] }
 0x5ce   :  { %3409 = vmatprep.subr.bf16.mxu0 %v3408_v44 }
 0x5cf   :  { %3367 = vmatpush3.bf16.msra.mxu1 %v3364_v47  ;;  %3411 = vmatpush3.bf16.msra.mxu0 %v3408_v44 }
 0x5d0   :  { %3369 = vmatprep.subr.bf16.mxu1 %v3368_v49 }
 0x5d3   :  { %3371 = vmatpush3.bf16.msra.mxu1 %v3368_v49 }
 0x5d4   :  { %3373 = vmatprep.subr.bf16.mxu1 %v3372_v52 }
 0x5d7   :  { %3375 = vmatpush3.bf16.msra.mxu1 %v3372_v52  ;;  %v1151_v52 = vld [vmem:[#allocation2 + $0x430] sm:$0xff] }
 0x5d8   :  { %3377 = vmatprep.subr.bf16.mxu1 %v3376_v56 }
 0x5db   :  { %3379 = vmatpush3.bf16.msra.mxu1 %v3376_v56  ;;  %v3444_v56 = vpack.c.bf16 %v1152_v55, %v1151_v52 }
 0x5dc   :  { %3413 = vmatprep.subr.bf16.mxu1 %v3412_v54 }
 0x5dd   :  { %3445 = vmatprep.subr.bf16.mxu0 %v3444_v56 }
 0x651   :  { %v900_v5 = vpop.xlane.xlu1 %899 }
 0x652   :  { %v902_v1 = vmul.f32 0.03125, %v900_v5  ;;  %v898_v22 = vpop.xlane.xlu0 %897  ;;  %v1141_v5 = vld [vmem:[#allocation2 + $0x3e0] sm:$0xff] }
 0x653   :  { %v901_v23 = vmul.f32 0.03125, %v898_v22 }
 0x654   :  { %v912_v6 = vmul.f32 %v902_v1, %v902_v1  ;;  %v920_v14 = vsub.f32 %v3914_v32, %v902_v1  ;;  %v2321_v32 = vld [vmem:[#allocation2 + $0x3a4] ss:$0 sm:$0xff]  ;;  %v1142_v1 = vld [vmem:[#allocation2 + $0x3e8] sm:$0xff] }
 0x655   :  { %v908_v9 = vpop.xlane.xlu1 %907  ;;  %v911_v25 = vmul.f32 %v901_v23, %v901_v23  ;;  %v919_v31 = vsub.f32 %v3917_v33, %v901_v23  ;;  %v3424_v22 = vpack.c.bf16 %v1142_v1, %v1141_v5  ;;  %v1157_v23 = vld [vmem:[#allocation2 + $0x460] sm:$0xff] }
 0x656   :  { %v910_v24 = vmul.f32 0.03125, %v908_v9  ;;  %v906_v13 = vpop.xlane.xlu0 %905  ;;  %v1158_v9 = vld [vmem:[#allocation2 + $0x468] sm:$0xff] }
 0x657   :  { %v909_v10 = vmul.f32 0.03125, %v906_v13  ;;  %v1144_v13 = vld [vmem:[#allocation2 + $0x3f8] sm:$0xff] }
 0x658   :  { %v914_v26 = vsub.f32 %v910_v24, %v912_v6  ;;  %v3456_v6 = vpack.c.bf16 %v1158_v9, %v1157_v23  ;;  %v1143_v24 = vld [vmem:[#allocation2 + $0x3f0] sm:$0xff]  ;;  %v1174_v23 = vld [vmem:[#allocation2 + $0x4e8] sm:$0xff] }
 0x659   :  { %v913_v27 = vsub.f32 %v909_v10, %v911_v25  ;;  %v3428_v25 = vpack.c.bf16 %v1144_v13, %v1143_v24  ;;  %v1159_v10 = vld [vmem:[#allocation2 + $0x470] sm:$0xff]  ;;  %v1176_v24 = vld [vmem:[#allocation2 + $0x4f8] sm:$0xff] }
 0x65a   :  { %v916_v17 = vadd.f32 1e-05, %v914_v26  ;;  %v1160_v26 = vld [vmem:[#allocation2 + $0x478] sm:$0xff] }
 0x65b   :  { %v915_v28 = vadd.f32 1e-05, %v913_v27  ;;  %v1145_v27 = vld [vmem:[#allocation2 + $0x400] sm:$0xff] }
 0x65c   :  { %3691 = vrsqrt.f32 %v916_v17  ;;  %v3460_v17 = vpack.c.bf16 %v1160_v26, %v1159_v10  ;;  %v1178_v10 = vld [vmem:[#allocation2 + $0x508] sm:$0xff] }
 0x65d   :  { %3693 = vrsqrt.f32 %v915_v28  ;;  %v1146_v28 = vld [vmem:[#allocation2 + $0x408] sm:$0xff] }
 0x666   :  { %v3692_v29 = vpop.eup %3691 }
 0x667   :  { %v3694_v35 = vpop.eup %3693  ;;  %v922_v36 = vmul.f32 %v3692_v29, %v920_v14  ;;  %v1161_v14 = vld [vmem:[#allocation2 + $0x480] sm:$0xff]  ;;  %v1162_v29 = vld [vmem:[#allocation2 + $0x488] sm:$0xff] }
 0x668   :  { %v921_v37 = vmul.f32 %v3694_v35, %v919_v31  ;;  %v3432_v31 = vpack.c.bf16 %v1146_v28, %v1145_v27  ;;  %v1147_v35 = vld [vmem:[#allocation2 + $0x410] sm:$0xff] }
 0x669   :  { %v928_v53 = vmul.f32 %v2319_v34, %v922_v36  ;;  %v1148_v36 = vld [vmem:[#allocation2 + $0x418] sm:$0xff]  ;;  %v1179_v27 = vld [vmem:[#allocation2 + $0x510] sm:$0xff] }
 0x66a   :  { %v927_v30 = vmul.f32 %v2319_v34, %v921_v37  ;;  %v3464_v34 = vpack.c.bf16 %v1162_v29, %v1161_v14  ;;  %v1163_v37 = vld [vmem:[#allocation2 + $0x490] sm:$0xff]  ;;  %v1181_v14 = vld [vmem:[#allocation2 + $0x520] sm:$0xff]  ;;  %v1182_v29 = vld [vmem:[#allocation2 + $0x528] sm:$0xff] }
 0x66b   :  { %v934_v41 = vadd.f32 %v2320_v39, %v928_v53  ;;  %v3436_v53 = vpack.c.bf16 %v1148_v36, %v1147_v35  ;;  %v2325_v35 = vld [vmem:[#allocation2 + $0x6b0] ss:$0 sm:$0xff] }
 0x66c   :  { %v933_v40 = vadd.f32 %v2320_v39, %v927_v30  ;;  %v1164_v39 = vld [vmem:[#allocation2 + $0x498] sm:$0xff] }
 0x66d   :  { %v3468_v30 = vpack.c.bf16 %v1164_v39, %v1163_v37 }
 0x66e   :  { %2862 = vmatprep.mubr.f32.mxu1 %v933_v40 }
 0x66f   :  { %2863 = vmatmul.mubr.f32.vlgmr.msra.gmra.mrb[20].mxu1 %v934_v41 }
 0x670   :  { %3415 = vmatpush3.bf16.msra.mxu1 %v3412_v54 }
 0x671   :  { %3417 = vmatprep.subr.bf16.mxu1 %v3416_v7 }
 0x674   :  { %3419 = vmatpush3.bf16.msra.mxu1 %v3416_v7 }
 0x675   :  { %3421 = vmatprep.subr.bf16.mxu1 %v3420_v18 }
 0x678   :  { %3423 = vmatpush3.bf16.msra.mxu1 %v3420_v18  ;;  %v1169_v18 = vld [vmem:[#allocation2 + $0x4c0] sm:$0xff] }
 0x679   :  { %3425 = vmatprep.subr.bf16.mxu1 %v3424_v22  ;;  %v3480_v5 = vpack.c.bf16 %v1170_v19, %v1169_v18 }
 0x67c   :  { %3427 = vmatpush3.bf16.msra.mxu1 %v3424_v22  ;;  %v1173_v22 = vld [vmem:[#allocation2 + $0x4e0] sm:$0xff] }
 0x67d   :  { %3429 = vmatprep.subr.bf16.mxu1 %v3428_v25  ;;  %v3488_v9 = vpack.c.bf16 %v1174_v23, %v1173_v22  ;;  %v3748_v22 = vld [vmem:[#allocation2 + $0x60] sm:$0xff] }
 0x680   :  { %3431 = vmatpush3.bf16.msra.mxu1 %v3428_v25  ;;  %v1177_v25 = vld [vmem:[#allocation2 + $0x500] sm:$0xff] }
 0x681   :  { %3433 = vmatprep.subr.bf16.mxu1 %v3432_v31  ;;  %v3496_v26 = vpack.c.bf16 %v1178_v10, %v1177_v25 }
 0x684   :  { %3435 = vmatpush3.bf16.msra.mxu1 %v3432_v31  ;;  %v3504_v31 = vpack.c.bf16 %v1182_v29, %v1181_v14  ;;  %v3751_v29 = vld [vmem:[#allocation2 + $0x88] sm:$0xff] }
 0x685   :  { %3437 = vmatprep.subr.bf16.mxu1 %v3436_v53 }
 0x688   :  { %3439 = vmatpush3.bf16.msra.mxu1 %v3436_v53 }
 0x742   :  { %v2864_v45 = vpop.f32.mrb[20].mxu1 }
 0x743   :  { %v1011_v46 = vadd.f32 %v2864_v45, %v2321_v32  ;;  %v1005_v33 = vpop.f32.mrb[21].mxu1  ;;  %v1167_v45 = vld [vmem:[#allocation2 + $0x4b0] sm:$0xff] }
 0x744   :  { %v1006_v47 = vadd.f32 %v2321_v32, %v1005_v33  ;;  %v3472_v32 = vpack.c.bf16 %v1166_v43, %v1165_v42 }
 0x745   :  { %v1015_v49 = vmax.f32 %v1011_v46, 0.0  ;;  %v1168_v46 = vld [vmem:[#allocation2 + $0x4b8] sm:$0xff] }
 0x746   :  { %v1014_v48 = vmax.f32 %v1006_v47, 0.0  ;;  %v3476_v33 = vpack.c.bf16 %v1168_v46, %v1167_v45 }
 0x748   :  { %2897 = vmatprep.mubr.f32.mxu0 %v1014_v48 }
 0x749   :  { %2898 = vmatmul.mubr.f32.vlgmr.msra.gmra.mrb[6].mxu0 %v1015_v49 }
 0x74a   :  { %3447 = vmatpush3.bf16.msra.mxu0 %v3444_v56 }
 0x74b   :  { %3449 = vmatprep.subr.bf16.mxu0 %v3448_v12 }
 0x74e   :  { %3451 = vmatpush3.bf16.msra.mxu0 %v3448_v12  ;;  %v2324_v12 = vld [vmem:[#allocation2 + $0x3a9] ss:$0 sm:$0xff] }
 0x74f   :  { %3453 = vmatprep.subr.bf16.mxu0 %v3452_v21 }
 0x752   :  { %3455 = vmatpush3.bf16.msra.mxu0 %v3452_v21 }
 0x753   :  { %3457 = vmatprep.subr.bf16.mxu0 %v3456_v6 }
 0x756   :  { %3459 = vmatpush3.bf16.msra.mxu0 %v3456_v6  ;;  %v1175_v6 = vld [vmem:[#allocation2 + $0x4f0] sm:$0xff] }
 0x757   :  { %3461 = vmatprep.subr.bf16.mxu0 %v3460_v17  ;;  %v3492_v13 = vpack.c.bf16 %v1176_v24, %v1175_v6 }
 0x75a   :  { %3463 = vmatpush3.bf16.msra.mxu0 %v3460_v17  ;;  %v1180_v17 = vld [vmem:[#allocation2 + $0x518] sm:$0xff] }
 0x75b   :  { %3465 = vmatprep.subr.bf16.mxu0 %v3464_v34  ;;  %v3500_v28 = vpack.c.bf16 %v1180_v17, %v1179_v27 }
 0x75e   :  { %3467 = vmatpush3.bf16.msra.mxu0 %v3464_v34  ;;  %v2326_v34 = vld [vmem:[#allocation2 + $0x6b1] ss:$0 sm:$0xff] }
 0x75f   :  { %3469 = vmatprep.subr.bf16.mxu0 %v3468_v30 }
 0x762   :  { %3471 = vmatpush3.bf16.msra.mxu0 %v3468_v30 }
 0x763   :  { %3473 = vmatprep.subr.bf16.mxu0 %v3472_v32 }
 0x766   :  { %3475 = vmatpush3.bf16.msra.mxu0 %v3472_v32  ;;  %v3949_v32 = vld [vmem:[#allocation2 + $0x10] sm:$0xff] }
 0x81c   :  { %v2899_v58 = vpop.f32.mrb[6].mxu0 }
 0x81d   :  { %v1092_v59 = vadd.f32 %v2899_v58, %v2322_v57  ;;  %v1086_v60 = vpop.f32.mrb[7].mxu0 }
 0x81e   :  { %v1087_v61 = vadd.f32 %v2322_v57, %v1086_v60 }
 0x81f   :  { %v3927_v62 = vadd.f32 %v1092_v59, %v934_v41  ;;  %v1150_v41 = vld [vmem:[#allocation2 + $0x428] sm:$0xff] }
 0x820   :  { %v3929_v63 = vadd.f32 %v1087_v61, %v933_v40  ;;  %v1149_v40 = vld [vmem:[#allocation2 + $0x420] sm:$0xff] }
 0x821   :  { %1099 = vadd.xlane.f32.xlu1 %v3927_v62  ;;  %v1104_v0 = vmul.f32 %v3927_v62, %v3927_v62  ;;  %v3440_v44 = vpack.c.bf16 %v1150_v41, %v1149_v40 }
 0x822   :  { %1097 = vadd.xlane.f32.xlu0 %v3929_v63  ;;  %v1103_v2 = vmul.f32 %v3929_v63, %v3929_v63 }
 0x823   :  { %3441 = vmatprep.subr.bf16.mxu1 %v3440_v44 }
 0x824   :  { %3443 = vmatpush3.bf16.msra.mxu1 %v3440_v44 }
 0x825   :  { %1107 = vadd.xlane.f32.xlu1 %v1104_v0  ;;  %3477 = vmatprep.subr.bf16.mxu1 %v3476_v33 }
 0x826   :  { %1105 = vadd.xlane.f32.xlu0 %v1103_v2 }
 0x8ae   :  { %v1100_v47 = vpop.xlane.xlu1 %1099 }
 0x8af   :  { %v1102_v48 = vmul.f32 0.03125, %v1100_v47  ;;  %v1098_v49 = vpop.xlane.xlu0 %1097 }
 0x8b0   :  { %v1101_v50 = vmul.f32 0.03125, %v1098_v49 }
 0x8b1   :  { %v1112_v52 = vmul.f32 %v1102_v48, %v1102_v48  ;;  %v1120_v0 = vsub.f32 %v3927_v62, %v1102_v48  ;;  %v1171_v62 = vld [vmem:[#allocation2 + $0x4d0] sm:$0xff]  ;;  %v3955_v48 = vld [vmem:[#allocation2 + $0x20] sm:$0xff] }
 0x8b2   :  { %v1108_v51 = vpop.xlane.xlu1 %1107  ;;  %v1111_v56 = vmul.f32 %v1101_v50, %v1101_v50  ;;  %v1119_v3 = vsub.f32 %v3929_v63, %v1101_v50  ;;  %v1172_v63 = vld [vmem:[#allocation2 + $0x4d8] sm:$0xff]  ;;  %v3958_v50 = vld [vmem:[#allocation2 + $0x28] sm:$0xff] }
 0x8b3   :  { %v1110_v54 = vmul.f32 0.03125, %v1108_v51  ;;  %v1106_v55 = vpop.xlane.xlu0 %1105  ;;  %v3484_v1 = vpack.c.bf16 %v1172_v63, %v1171_v62  ;;  %v3747_v62 = vld [vmem:[#allocation2 + $0x68] sm:$0xff] }
 0x8b4   :  { %v1109_v57 = vmul.f32 0.03125, %v1106_v55  ;;  %v3964_v55 = vld [vmem:[#allocation2 + $0x38] sm:$0xff] }
 0x8b5   :  { %v1114_v58 = vsub.f32 %v1110_v54, %v1112_v52  ;;  %v3961_v52 = vld [vmem:[#allocation2 + $0x30] sm:$0xff] }
 0x8b6   :  { %v1113_v59 = vsub.f32 %v1109_v57, %v1111_v56  ;;  %v3967_v57 = vld [vmem:[#allocation2 + $0x40] sm:$0xff] }
 0x8b7   :  { %v1116_v60 = vadd.f32 1e-05, %v1114_v58 }
 0x8b8   :  { %v1115_v61 = vadd.f32 1e-05, %v1113_v59  ;;  %v3970_v59 = vld [vmem:[#allocation2 + $0x48] sm:$0xff] }
 0x8b9   :  { %3695 = vrsqrt.f32 %v1116_v60 }
 0x8ba   :  { %3697 = vrsqrt.f32 %v1115_v61  ;;  %v2327_v61 = vld [vmem:[#allocation2 + $0x6b2] ss:$0 sm:$0xff] }
 0x8c3   :  { %v3696_v2 = vpop.eup %3695 }
 0x8c4   :  { %v3698_v7 = vpop.eup %3697  ;;  %v1122_v8 = vmul.f32 %v3696_v2, %v1120_v0 }
 0x8c5   :  { %v1121_v11 = vmul.f32 %v3698_v7, %v1119_v3 }
 0x8c6   :  { %v1128_v15 = vmul.f32 %v2323_v4, %v1122_v8 }
 0x8c7   :  { %v1127_v16 = vmul.f32 %v2323_v4, %v1121_v11  ;;  %v3745_v11 = vld [vmem:[#allocation2 + $0x58] sm:$0xff] }
 0x8c8   :  { %v3941_v21 = vadd.f32 %v2324_v12, %v1128_v15 }
 0x8c9   :  { %v3939_v20 = vadd.f32 %v2324_v12, %v1127_v16  ;;  %v3746_v16 = vld [vmem:[#allocation2 + $0x50] sm:$0xff] }
 0x8cb   :  { %2932 = vmatprep.mubr.f32.mxu1 %v3939_v20  ;;  %2967 = vmatprep.mubr.f32.mxu0 %v3939_v20 }
 0x8cc   :  { %2933 = vmatmul.mubr.f32.vlgmr.msra.gmra.mrb[22].mxu1 %v3941_v21  ;;  %2968 = vmatmul.mubr.f32.vlgmr.msra.gmra.mrb[8].mxu0 %v3941_v21 }
 0x8cd   :  { %3479 = vmatpush3.bf16.msra.mxu1 %v3476_v33  ;;  %3002 = vmatprep.mubr.f32.mxu1 %v3939_v20  ;;  %v3952_v33 = vld [vmem:[#allocation2 + $0x18] sm:$0xff] }
 0x8ce   :  { %3481 = vmatprep.subr.bf16.mxu1 %v3480_v5 }
 0x8d1   :  { %3483 = vmatpush3.bf16.msra.mxu1 %v3480_v5 }
 0x8d2   :  { %3485 = vmatprep.subr.bf16.mxu1 %v3484_v1 }
 0x8d5   :  { %3487 = vmatpush3.bf16.msra.mxu1 %v3484_v1 }
 0x8d6   :  { %3489 = vmatprep.subr.bf16.mxu1 %v3488_v9 }
 0x8d9   :  { %3491 = vmatpush3.bf16.msra.mxu1 %v3488_v9 }
 0x8da   :  { %3493 = vmatprep.subr.bf16.mxu1 %v3492_v13 }
 0x8dd   :  { %3495 = vmatpush3.bf16.msra.mxu1 %v3492_v13  ;;  %v3749_v13 = vld [vmem:[#allocation2 + $0x78] sm:$0xff] }
 0x8de   :  { %3497 = vmatprep.subr.bf16.mxu1 %v3496_v26 }
 0x8e1   :  { %3499 = vmatpush3.bf16.msra.mxu1 %v3496_v26  ;;  %v3750_v26 = vld [vmem:[#allocation2 + $0x70] sm:$0xff] }
 0x8e2   :  { %3501 = vmatprep.subr.bf16.mxu1 %v3500_v28 }
 0x8e5   :  { %3503 = vmatpush3.bf16.msra.mxu1 %v3500_v28 }
 0x8e6   :  { %3505 = vmatprep.subr.bf16.mxu1 %v3504_v31 }
 0x8e9   :  { %3507 = vmatpush3.bf16.msra.mxu1 %v3504_v31 }
 0x8ec   :  { %3003 = vmatmul.mubr.f32.vlgmr.msra.gmra.mrb[24].mxu1 %v3941_v21 }
 0x99f   :  { %v2934_v36 = vpop.f32.mrb[22].mxu1  ;;  %v2969_v37 = vpop.f32.mrb[8].mxu0 }
 0x9a0   :  { %v1398_v39 = vadd.f32 %v2969_v37, %v2326_v34  ;;  %v1311_v53 = vpop.f32.mrb[23].mxu1  ;;  %v1392_v30 = vpop.f32.mrb[9].mxu0  ;;  %v1317_v42 = vadd.f32 %v2934_v36, %v2325_v35 }
 0x9a1   :  { %v1312_v40 = vadd.f32 %v2325_v35, %v1311_v53  ;;  %v1393_v41 = vadd.f32 %v2326_v34, %v1392_v30  ;;  %v3752_v35 = vld [vmem:[#allocation2 + $0x80] sm:$0xff] }
 0x9a2   :  { %v1321_v46 = vmul.f32 0.35355338, %v1317_v42 }
 0x9a3   :  { %v1320_v43 = vmul.f32 0.35355338, %v1312_v40  ;;  %v3508_v44 = vpack.c.bf16 %v1398_v39, %v1393_v41 }
 0x9a4   :  { %v1481_v47 = vmul.f32 %v3952_v33, %v1321_v46  ;;  %v1483_v51 = vmul.f32 %v3958_v50, %v1321_v46  ;;  %v1485_v56 = vmul.f32 %v3964_v55, %v1321_v46  ;;  %v1487_v60 = vmul.f32 %v3970_v59, %v1321_v46 }
 0x9a5   :  { %3509 = vmatprep.subr.bf16.mxu0 %v3508_v44  ;;  %v1480_v45 = vmul.f32 %v3949_v32, %v1320_v43  ;;  %v1482_v49 = vmul.f32 %v3955_v48, %v1320_v43  ;;  %v1484_v54 = vmul.f32 %v3961_v52, %v1320_v43  ;;  %v1486_v58 = vmul.f32 %v3967_v57, %v1320_v43 }
 0x9a6   :  { %3511 = vmatpush3.bf16.xpose.msra.mxu0 %v3508_v44 }
 0x9a7   :  { %3009 = vmatprep.mubr.f32.mxu0 %v1480_v45 }
 0x9ad   :  { %3010 = vmatmul.mubr.f32.vlgmr.msra.gmra.mrb[10].mxu0 %v1481_v47 }
 0x9ae   :  { %3012 = vmatprep.mubr.f32.mxu0 %v1482_v49 }
 0x9b1   :  { %3013 = vmatmul.mubr.f32.gmra.mrb[12].mxu0 %v1483_v51 }
 0x9b2   :  { %3015 = vmatprep.mubr.f32.mxu0 %v1484_v54 }
 0x9b5   :  { %3016 = vmatmul.mubr.f32.gmra.mrb[14].mxu0 %v1485_v56 }
 0x9b6   :  { %3018 = vmatprep.mubr.f32.mxu0 %v1486_v58 }
 0x9b9   :  { %3019 = vmatmul.mubr.f32.gmra.mrb[16].mxu0 %v1487_v60 }
 0x9ba   :  { %3053 = vmatprep.mubr.msk.f32.mxu0 %vm734_vm1, %v3900_v38 }
 0x9bf   :  { %v3004_v0 = vpop.f32.mrb[24].mxu1 }
 0x9c0   :  { %v1477_v2 = vadd.f32 %v3004_v0, %v2327_v61  ;;  %v1471_v3 = vpop.f32.mrb[25].mxu1 }
 0x9c1   :  { %v1472_v4 = vadd.f32 %v2327_v61, %v1471_v3 }
 0x9c3   :  { %v3512_v7 = vpack.c.bf16 %v1477_v2, %v1472_v4 }
 0x9c5   :  { %3513 = vmatprep.subr.bf16.mxu1 %v3512_v7 }
 0x9c6   :  { %3515 = vmatpush3.bf16.msra.mxu1 %v3512_v7 }
 0xa80   :  { %v3011_v8 = vpop.f32.mrb[10].mxu0 }
 0xa81   :  { %v1560_v12 = vadd.f32 %v3745_v11, %v3011_v8  ;;  %v1554_v15 = vpop.f32.mrb[11].mxu0 }
 0xa82   :  { %v1555_v18 = vadd.f32 %v3746_v16, %v1554_v15 }
 0xa83   :  { %v1596_v19 = vsel %vm508_vm0, %v1560_v12, -inf }
 0xa84   :  { %1597 = vmax.xlane.f32.xlu1 %v1596_v19  ;;  %v3014_v5 = vpop.f32.mrb[12].mxu0  ;;  %v1593_v38 = vsel %vm508_vm0, %v1555_v18, -inf }
 0xa85   :  { %v1570_v63 = vadd.f32 %v3747_v62, %v3014_v5  ;;  %v1564_v1 = vpop.f32.mrb[13].mxu0  ;;  %1594 = vmax.xlane.f32.xlu0 %v1593_v38 }
 0xa86   :  { %v1565_v23 = vadd.f32 %v3748_v22, %v1564_v1 }
 0xa87   :  { %v1602_v9 = vsel %vm508_vm0, %v1570_v63, -inf }
 0xa88   :  { %1603 = vmax.xlane.f32.xlu1 %v1602_v9  ;;  %v3017_v6 = vpop.f32.mrb[14].mxu0  ;;  %v1599_v24 = vsel %vm508_vm0, %v1565_v23, -inf }
 0xa89   :  { %v1580_v25 = vadd.f32 %v3749_v13, %v3017_v6  ;;  %v1574_v10 = vpop.f32.mrb[15].mxu0  ;;  %1600 = vmax.xlane.f32.xlu0 %v1599_v24 }
 0xa8a   :  { %v1575_v27 = vadd.f32 %v3750_v26, %v1574_v10 }
 0xa8b   :  { %v1608_v17 = vsel %vm508_vm0, %v1580_v25, -inf }
 0xa8c   :  { %1609 = vmax.xlane.f32.xlu1 %v1608_v17  ;;  %v3020_v28 = vpop.f32.mrb[16].mxu0  ;;  %v1605_v14 = vsel %vm508_vm0, %v1575_v27, -inf }
 0xa8d   :  { %v1590_v31 = vadd.f32 %v3751_v29, %v3020_v28  ;;  %v1584_v34 = vpop.f32.mrb[17].mxu0  ;;  %1606 = vmax.xlane.f32.xlu0 %v1605_v14 }
 0xa8e   :  { %v1585_v36 = vadd.f32 %v3752_v35, %v1584_v34 }
 0xa8f   :  { %v1614_v37 = vsel %vm508_vm0, %v1590_v31, -inf }
 0xa90   :  { %1615 = vmax.xlane.f32.xlu1 %v1614_v37  ;;  %v1611_v39 = vsel %vm508_vm0, %v1585_v36, -inf }
 0xa91   :  { %1612 = vmax.xlane.f32.xlu0 %v1611_v39 }
 0xb11   :  { %v1598_v53 = vpop.xlane.xlu1 %1597 }
 0xb12   :  { %v1618_v30 = vsub.f32 %v1560_v12, %v1598_v53  ;;  %v1595_v40 = vpop.xlane.xlu0 %1594 }
 0xb13   :  { %v1617_v41 = vsub.f32 %v1555_v18, %v1595_v40 }
 0xb14   :  { %v1627_v42 = vmul.f32 1.442695, %v1618_v30 }
 0xb15   :  { %v1625_v43 = vmul.f32 1.442695, %v1617_v41  ;;  %v1604_v44 = vpop.xlane.xlu1 %1603 }
 0xb16   :  { %3699 = vpow2.f32 %v1627_v42  ;;  %v1620_v45 = vsub.f32 %v1570_v63, %v1604_v44  ;;  %v1601_v46 = vpop.xlane.xlu0 %1600 }
 0xb17   :  { %3701 = vpow2.f32 %v1625_v43  ;;  %v1619_v47 = vsub.f32 %v1565_v23, %v1601_v46 }
 0xb18   :  { %v1631_v49 = vmul.f32 1.442695, %v1620_v45 }
 0xb19   :  { %v1629_v51 = vmul.f32 1.442695, %v1619_v47  ;;  %v1610_v54 = vpop.xlane.xlu1 %1609 }
 0xb1a   :  { %3703 = vpow2.f32 %v1631_v49  ;;  %v1622_v56 = vsub.f32 %v1580_v25, %v1610_v54  ;;  %v1607_v58 = vpop.xlane.xlu0 %1606  ;;  %v1183_v49 = vld [vmem:[#allocation2 + $0x530] sm:$0xff]  ;;  %v1185_v54 = vld [vmem:[#allocation2 + $0x540] sm:$0xff] }
 0xb1b   :  { %3705 = vpow2.f32 %v1629_v51  ;;  %v1621_v60 = vsub.f32 %v1575_v27, %v1607_v58  ;;  %v1184_v51 = vld [vmem:[#allocation2 + $0x538] sm:$0xff]  ;;  %v1186_v58 = vld [vmem:[#allocation2 + $0x548] sm:$0xff] }
 0xb1c   :  { %v1635_v61 = vmul.f32 1.442695, %v1622_v56  ;;  %v3532_v56 = vpack.c.bf16 %v1184_v51, %v1183_v49  ;;  %v1205_v51 = vld [vmem:[#allocation2 + $0x5e0] sm:$0xff] }
 0xb1d   :  { %v1633_v0 = vmul.f32 1.442695, %v1621_v60  ;;  %v1616_v2 = vpop.xlane.xlu1 %1615  ;;  %v3536_v60 = vpack.c.bf16 %v1186_v58, %v1185_v54  ;;  %v1206_v54 = vld [vmem:[#allocation2 + $0x5e8] sm:$0xff]  ;;  %v1207_v58 = vld [vmem:[#allocation2 + $0x5f0] sm:$0xff] }
 0xb1e   :  { %3707 = vpow2.f32 %v1635_v61  ;;  %v1624_v3 = vsub.f32 %v1590_v31, %v1616_v2  ;;  %v1613_v4 = vpop.xlane.xlu0 %1612  ;;  %v1187_v61 = vld [vmem:[#allocation2 + $0x550] sm:$0xff]  ;;  %3533 = vmatprep.subr.bf16.mxu1 %v3532_v56 }
 0xb1f   :  { %3709 = vpow2.f32 %v1633_v0  ;;  %v1623_v7 = vsub.f32 %v1585_v36, %v1613_v4  ;;  %v1188_v0 = vld [vmem:[#allocation2 + $0x558] sm:$0xff]  ;;  %v1190_v4 = vld [vmem:[#allocation2 + $0x568] sm:$0xff] }
 0xb20   :  { %v3700_v8 = vpop.eup %3699  ;;  %v1639_v11 = vmul.f32 1.442695, %v1624_v3  ;;  %v3540_v2 = vpack.c.bf16 %v1188_v0, %v1187_v61  ;;  %v1189_v3 = vld [vmem:[#allocation2 + $0x560] sm:$0xff] }
 0xb21   :  { %v3702_v12 = vpop.eup %3701  ;;  %v1637_v15 = vmul.f32 1.442695, %v1623_v7  ;;  %v1644_v16 = vsel %vm508_vm0, %v3700_v8, 0.0  ;;  %v3544_v7 = vpack.c.bf16 %v1190_v4, %v1189_v3  ;;  %v1209_v61 = vld [vmem:[#allocation2 + $0x600] sm:$0xff]  ;;  %v1211_v4 = vld [vmem:[#allocation2 + $0x610] sm:$0xff] }
 0xb22   :  { %3711 = vpow2.f32 %v1639_v11  ;;  %1645 = vadd.xlane.f32.xlu1 %v1644_v16  ;;  %v1641_v18 = vsel %vm508_vm0, %v3702_v12, 0.0  ;;  %v1192_v11 = vld [vmem:[#allocation2 + $0x578] sm:$0xff]  ;;  %v1194_v16 = vld [vmem:[#allocation2 + $0x588] sm:$0xff] }
 0xb23   :  { %3713 = vpow2.f32 %v1637_v15  ;;  %1642 = vadd.xlane.f32.xlu0 %v1641_v18  ;;  %v1193_v15 = vld [vmem:[#allocation2 + $0x580] sm:$0xff] }
 0xb24   :  { %v3704_v19 = vpop.eup %3703  ;;  %v3552_v18 = vpack.c.bf16 %v1194_v16, %v1193_v15  ;;  %v1215_v16 = vld [vmem:[#allocation2 + $0x630] sm:$0xff] }
 0xb25   :  { %v3706_v5 = vpop.eup %3705  ;;  %v1650_v38 = vsel %vm508_vm0, %v3704_v19, 0.0 }
 0xb26   :  { %1651 = vadd.xlane.f32.xlu1 %v1650_v38  ;;  %v1647_v62 = vsel %vm508_vm0, %v3706_v5, 0.0 }
 0xb27   :  { %1648 = vadd.xlane.f32.xlu0 %v1647_v62  ;;  %v1197_v62 = vld [vmem:[#allocation2 + $0x5a0] sm:$0xff] }
 0xb28   :  { %v3708_v63 = vpop.eup %3707 }
 0xb29   :  { %v3710_v1 = vpop.eup %3709  ;;  %v1656_v22 = vsel %vm508_vm0, %v3708_v63, 0.0 }
 0xb2a   :  { %1657 = vadd.xlane.f32.xlu1 %v1656_v22  ;;  %v1653_v23 = vsel %vm508_vm0, %v3710_v1, 0.0 }
 0xb2b   :  { %1654 = vadd.xlane.f32.xlu0 %v1653_v23 }
 0xb2c   :  { %v3712_v9 = vpop.eup %3711 }
 0xb2d   :  { %v3714_v6 = vpop.eup %3713  ;;  %v1662_v24 = vsel %vm508_vm0, %v3712_v9, 0.0 }
 0xb2e   :  { %1663 = vadd.xlane.f32.xlu1 %v1662_v24  ;;  %v1659_v13 = vsel %vm508_vm0, %v3714_v6, 0.0 }
 0xb2f   :  { %1660 = vadd.xlane.f32.xlu0 %v1659_v13 }
 0xbaf   :  { %v1646_v25 = vpop.xlane.xlu1 %1645 }
 0xbb0   :  { %3715 = vrcp.f32 %v1646_v25  ;;  %v1643_v10 = vpop.xlane.xlu0 %1642 }
 0xbb1   :  { %3717 = vrcp.f32 %v1643_v10 }
 0xbb3   :  { %v1652_v26 = vpop.xlane.xlu1 %1651 }
 0xbb4   :  { %3719 = vrcp.f32 %v1652_v26  ;;  %v1649_v27 = vpop.xlane.xlu0 %1648 }
 0xbb5   :  { %3721 = vrcp.f32 %v1649_v27 }
 0xbb7   :  { %v1658_v17 = vpop.xlane.xlu1 %1657 }
 0xbb8   :  { %3723 = vrcp.f32 %v1658_v17  ;;  %v1655_v28 = vpop.xlane.xlu0 %1654 }
 0xbb9   :  { %3725 = vrcp.f32 %v1655_v28 }
 0xbba   :  { %v3716_v14 = vpop.eup %3715 }
 0xbbb   :  { %v3718_v29 = vpop.eup %3717  ;;  %v1664_v31 = vpop.xlane.xlu1 %1663  ;;  %v1674_v36 = vmul.f32 %v3716_v14, %v3700_v8  ;;  %v1191_v8 = vld [vmem:[#allocation2 + $0x570] sm:$0xff] }
 0xbbc   :  { %3727 = vrcp.f32 %v1664_v31  ;;  %v1661_v34 = vpop.xlane.xlu0 %1660  ;;  %v1673_v35 = vmul.f32 %v3718_v29, %v3702_v12  ;;  %v3548_v12 = vpack.c.bf16 %v1192_v11, %v1191_v8  ;;  %v1213_v11 = vld [vmem:[#allocation2 + $0x620] sm:$0xff] }
 0xbbd   :  { %3729 = vrcp.f32 %v1661_v34 }
 0xbbe   :  { %v3720_v37 = vpop.eup %3719  ;;  %3025 = vmatprep.mubr.msk.f32.mxu1 %vm508_vm0, %v1673_v35  ;;  %v3753_v35 = vld [vmem:[#allocation2 + $0x98] sm:$0xff] }
 0xbbf   :  { %v3722_v39 = vpop.eup %3721  ;;  %3026 = vmatmul.mubr.msk.f32.vlgmr.msra.gmra.mrb[26].mxu1 %vm508_vm0, %v1674_v36  ;;  %v1676_v30 = vmul.f32 %v3720_v37, %v3704_v19  ;;  %v1195_v19 = vld [vmem:[#allocation2 + $0x590] sm:$0xff]  ;;  %v1200_v37 = vld [vmem:[#allocation2 + $0x5b8] sm:$0xff] }
 0xbc0   :  { %v1675_v53 = vmul.f32 %v3722_v39, %v3706_v5  ;;  %3535 = vmatpush3.bf16.msra.mxu1 %v3532_v56  ;;  %v1196_v5 = vld [vmem:[#allocation2 + $0x598] sm:$0xff]  ;;  %v3576_v56 = vpack.c.bf16 %v1206_v54, %v1205_v51  ;;  %v1229_v51 = vld [vmem:[#allocation2 + $0x6a0] sm:$0xff]  ;;  %v1230_v54 = vld [vmem:[#allocation2 + $0x6a8] sm:$0xff] }
 0xbc1   :  { %3537 = vmatprep.subr.bf16.mxu1 %v3536_v60  ;;  %v3556_v38 = vpack.c.bf16 %v1196_v5, %v1195_v19  ;;  %v1217_v19 = vld [vmem:[#allocation2 + $0x640] sm:$0xff] }
 0xbc2   :  { %v3724_v40 = vpop.eup %3723  ;;  %3028 = vmatprep.mubr.msk.f32.mxu1 %vm508_vm0, %v1675_v53 }
 0xbc3   :  { %v3726_v41 = vpop.eup %3725  ;;  %3029 = vmatmul.mubr.msk.f32.gmra.mrb[28].mxu1 %vm508_vm0, %v1676_v30  ;;  %v1678_v43 = vmul.f32 %v3724_v40, %v3708_v63  ;;  %v1198_v63 = vld [vmem:[#allocation2 + $0x5a8] sm:$0xff] }
 0xbc4   :  { %v1677_v42 = vmul.f32 %v3726_v41, %v3710_v1  ;;  %3539 = vmatpush3.bf16.msra.mxu1 %v3536_v60  ;;  %v3560_v1 = vpack.c.bf16 %v1198_v63, %v1197_v62  ;;  %v1208_v60 = vld [vmem:[#allocation2 + $0x5f8] sm:$0xff]  ;;  %v1219_v63 = vld [vmem:[#allocation2 + $0x650] sm:$0xff] }
 0xbc5   :  { %3541 = vmatprep.subr.bf16.mxu1 %v3540_v2  ;;  %v3580_v0 = vpack.c.bf16 %v1208_v60, %v1207_v58 }
 0xbc6   :  { %v3728_v44 = vpop.eup %3727  ;;  %3031 = vmatprep.mubr.msk.f32.mxu1 %vm508_vm0, %v1677_v42 }
 0xbc7   :  { %v3730_v45 = vpop.eup %3729  ;;  %3032 = vmatmul.mubr.msk.f32.gmra.mrb[30].mxu1 %vm508_vm0, %v1678_v43  ;;  %v1680_v47 = vmul.f32 %v3728_v44, %v3712_v9 }
 0xbc8   :  { %v1679_v46 = vmul.f32 %v3730_v45, %v3714_v6  ;;  %3543 = vmatpush3.bf16.msra.mxu1 %v3540_v2  ;;  %v1201_v45 = vld [vmem:[#allocation2 + $0x5c0] sm:$0xff]  ;;  %v1210_v2 = vld [vmem:[#allocation2 + $0x608] sm:$0xff] }
 0xbc9   :  { %3545 = vmatprep.subr.bf16.mxu1 %v3544_v7  ;;  %v3584_v3 = vpack.c.bf16 %v1210_v2, %v1209_v61 }
 0xbca   :  { %3034 = vmatprep.mubr.msk.f32.mxu1 %vm508_vm0, %v1679_v46  ;;  %v1202_v46 = vld [vmem:[#allocation2 + $0x5c8] sm:$0xff] }
 0xbcb   :  { %3035 = vmatmul.mubr.msk.f32.gmra.mrb[32].mxu1 %vm508_vm0, %v1680_v47  ;;  %v3568_v47 = vpack.c.bf16 %v1202_v46, %v1201_v45  ;;  %v2340_v46 = vld [vmem:[#allocation2 + $0x6b7] ss:$0 sm:$0xff] }
 0xbcc   :  { %3547 = vmatpush3.bf16.msra.mxu1 %v3544_v7  ;;  %v1212_v7 = vld [vmem:[#allocation2 + $0x618] sm:$0xff] }
 0xbcd   :  { %3549 = vmatprep.subr.bf16.mxu1 %v3548_v12  ;;  %v3588_v8 = vpack.c.bf16 %v1212_v7, %v1211_v4  ;;  %v2196_v4 = vld [vmem:[#allocation2 + $0x6c8] sm:$0xff]  ;;  %v3805_v7 = vmov 0.0|0.0  }
 0xbd0   :  { %3551 = vmatpush3.bf16.msra.mxu1 %v3548_v12  ;;  %v1214_v12 = vld [vmem:[#allocation2 + $0x628] sm:$0xff] }
 0xbd1   :  { %3553 = vmatprep.subr.bf16.mxu1 %v3552_v18  ;;  %v3592_v15 = vpack.c.bf16 %v1214_v12, %v1213_v11  ;;  %v2342_v11 = vld [vmem:[#allocation2 + $0x6b5] ss:$0 sm:$0xff] }
 0xbd4   :  { %3555 = vmatpush3.bf16.msra.mxu1 %v3552_v18  ;;  %v1216_v18 = vld [vmem:[#allocation2 + $0x638] sm:$0xff] }
 0xbd5   :  { %3557 = vmatprep.subr.bf16.mxu1 %v3556_v38  ;;  %v3596_v5 = vpack.c.bf16 %v1216_v18, %v1215_v16 }
 0xbd8   :  { %3559 = vmatpush3.bf16.msra.mxu1 %v3556_v38  ;;  %v1218_v38 = vld [vmem:[#allocation2 + $0x648] sm:$0xff] }
 0xbd9   :  { %3561 = vmatprep.subr.bf16.mxu1 %v3560_v1  ;;  %v3600_v62 = vpack.c.bf16 %v1218_v38, %v1217_v19  ;;  %v2198_v38 = vld [vmem:[#allocation2 + $0x6d8] sm:$0xff] }
 0xbdc   :  { %3563 = vmatpush3.bf16.msra.mxu1 %v3560_v1  ;;  %v1220_v1 = vld [vmem:[#allocation2 + $0x658] sm:$0xff] }
 0xbdd   :  { %3597 = vmatprep.subr.bf16.mxu1 %v3596_v5 }
 0xc92   :  { %v3027_v22 = vpop.f32.mrb[26].mxu1 }
 0xc93   :  { %v1811_v23 = vmul.f32 %v3952_v33, %v3027_v22  ;;  %v1771_v9 = vpop.f32.mrb[27].mxu1  ;;  %v3604_v22 = vpack.c.bf16 %v1220_v1, %v1219_v63  ;;  %v2199_v63 = vld [vmem:[#allocation2 + $0x6e0] sm:$0xff]  ;;  %v2200_v1 = vld [vmem:[#allocation2 + $0x6e8] sm:$0xff] }
 0xc94   :  { %v1810_v6 = vmul.f32 %v3949_v32, %v1771_v9  ;;  %v1222_v9 = vld [vmem:[#allocation2 + $0x668] sm:$0xff] }
 0xc96   :  { %v3516_v24 = vpack.c.bf16 %v1811_v23, %v1810_v6  ;;  %v3030_v13 = vpop.f32.mrb[28].mxu1  ;;  %v1221_v23 = vld [vmem:[#allocation2 + $0x660] sm:$0xff] }
 0xc97   :  { %v1813_v25 = vmul.f32 %v3958_v50, %v3030_v13  ;;  %v1781_v10 = vpop.f32.mrb[29].mxu1  ;;  %v3608_v6 = vpack.c.bf16 %v1222_v9, %v1221_v23  ;;  %v1224_v13 = vld [vmem:[#allocation2 + $0x678] sm:$0xff]  ;;  %v2201_v23 = vld [vmem:[#allocation2 + $0x6f0] sm:$0xff] }
 0xc98   :  { %v1812_v26 = vmul.f32 %v3955_v48, %v1781_v10  ;;  %3517 = vmatprep.subr.bf16.mxu0 %v3516_v24  ;;  %v1225_v10 = vld [vmem:[#allocation2 + $0x680] sm:$0xff]  ;;  %v2202_v9 = vld [vmem:[#allocation2 + $0x6f8] sm:$0xff] }
 0xc99   :  { %3519 = vmatpush3.bf16.msra.mxu0 %v3516_v24  ;;  %v1223_v24 = vld [vmem:[#allocation2 + $0x670] sm:$0xff] }
 0xc9a   :  { %v3520_v27 = vpack.c.bf16 %v1813_v25, %v1812_v26  ;;  %v3033_v17 = vpop.f32.mrb[30].mxu1  ;;  %v3612_v25 = vpack.c.bf16 %v1224_v13, %v1223_v24  ;;  %v1226_v26 = vld [vmem:[#allocation2 + $0x688] sm:$0xff]  ;;  %v2203_v24 = vld [vmem:[#allocation2 + $0x700] sm:$0xff] }
 0xc9b   :  { %v1815_v28 = vmul.f32 %v3964_v55, %v3033_v17  ;;  %v1791_v14 = vpop.f32.mrb[31].mxu1  ;;  %v1227_v17 = vld [vmem:[#allocation2 + $0x690] sm:$0xff]  ;;  %v2204_v13 = vld [vmem:[#allocation2 + $0x708] sm:$0xff] }
 0xc9c   :  { %v1814_v29 = vmul.f32 %v3961_v52, %v1791_v14  ;;  %3521 = vmatprep.subr.bf16.mxu0 %v3520_v27  ;;  %v1199_v52 = vld [vmem:[#allocation2 + $0x5b0] sm:$0xff] }
 0xc9d   :  { %3523 = vmatpush3.bf16.msra.mxu0 %v3520_v27  ;;  %v3564_v39 = vpack.c.bf16 %v1200_v37, %v1199_v52  ;;  %v3616_v27 = vpack.c.bf16 %v1226_v26, %v1225_v10  ;;  %v3807_v10 = vmov 0.0   ;;  %v2205_v26 = vld [vmem:[#allocation2 + $0x710] sm:$0xff] }
 0xc9e   :  { %v3524_v33 = vpack.c.bf16 %v1815_v28, %v1814_v29  ;;  %v3036_v32 = vpop.f32.mrb[32].mxu1  ;;  %v1228_v28 = vld [vmem:[#allocation2 + $0x698] sm:$0xff] }
 0xc9f   :  { %v1817_v31 = vmul.f32 %v3970_v59, %v3036_v32  ;;  %v1801_v34 = vpop.f32.mrb[33].mxu1  ;;  %v2338_v59 = vld [vmem:[#allocation2 + $0x6b3] ss:$0 sm:$0xff]  ;;  %v3620_v14 = vpack.c.bf16 %v1228_v28, %v1227_v17  ;;  %v2207_v28 = vld [vmem:[#allocation2 + $0x720] sm:$0xff] }
 0xca0   :  { %v1816_v50 = vmul.f32 %v3967_v57, %v1801_v34  ;;  %3525 = vmatprep.subr.bf16.mxu0 %v3524_v33 }
 0xca1   :  { %3527 = vmatpush3.bf16.msra.mxu0 %v3524_v33 }
 0xca2   :  { %v3528_v48 = vpack.c.bf16 %v1817_v31, %v1816_v50 }
 0xca4   :  { %3529 = vmatprep.subr.bf16.mxu0 %v3528_v48 }
 0xca5   :  { %3531 = vmatpush3.bf16.msra.mxu0 %v3528_v48 }
 0xca6   :  { %3565 = vmatprep.subr.bf16.mxu0 %v3564_v39 }
 0xca8   :  { %3054 = vmatmul.mubr.msk.f32.vlgmr.msra.gmra.mrb[18].mxu0 %vm734_vm1, %v3753_v35 }
 0xca9   :  { %3567 = vmatpush3.bf16.msra.mxu0 %v3564_v39 }
 0xcaa   :  { %3569 = vmatprep.subr.bf16.mxu0 %v3568_v47 }
 0xcad   :  { %3571 = vmatpush3.bf16.msra.mxu0 %v3568_v47 }
 0xd7b   :  { %v3055_v55 = vpop.f32.mrb[18].mxu0 }
 0xd7c   :  { %v1884_v36 = vpop.f32.mrb[19].mxu0 }
 0xd7d   :  { %3088 = vmatprep.mubr.f32.mxu1 %v1884_v36 }
 0xd7e   :  { %3089 = vmatmul.mubr.f32.vlgmr.msra.gmra.mrb[34].mxu1 %v3055_v55 }
 0xd7f   :  { %3599 = vmatpush3.bf16.msra.mxu1 %v3596_v5  ;;  %v2197_v5 = vld [vmem:[#allocation2 + $0x6d0] sm:$0xff] }
 0xd80   :  { %3601 = vmatprep.subr.bf16.mxu1 %v3600_v62 }
 0xd83   :  { %3603 = vmatpush3.bf16.msra.mxu1 %v3600_v62  ;;  %v3632_v62 = vpack.c.bf16 %v2198_v38, %v2197_v5 }
 0xd84   :  { %3605 = vmatprep.subr.bf16.mxu1 %v3604_v22 }
 0xd87   :  { %3607 = vmatpush3.bf16.msra.mxu1 %v3604_v22  ;;  %v3635_v22 = vpack.c.bf16 %v2200_v1, %v2199_v63 }
 0xd88   :  { %3609 = vmatprep.subr.bf16.mxu1 %v3608_v6 }
 0xd8b   :  { %3611 = vmatpush3.bf16.msra.mxu1 %v3608_v6  ;;  %v3638_v6 = vpack.c.bf16 %v2202_v9, %v2201_v23 }
 0xd8c   :  { %3613 = vmatprep.subr.bf16.mxu1 %v3612_v25 }
 0xd8f   :  { %3615 = vmatpush3.bf16.msra.mxu1 %v3612_v25  ;;  %v3641_v25 = vpack.c.bf16 %v2204_v13, %v2203_v24 }
 0xd90   :  { %3617 = vmatprep.subr.bf16.mxu1 %v3616_v27 }
 0xd93   :  { %3619 = vmatpush3.bf16.msra.mxu1 %v3616_v27  ;;  %v2206_v27 = vld [vmem:[#allocation2 + $0x718] sm:$0xff] }
 0xd94   :  { %3621 = vmatprep.subr.bf16.mxu1 %v3620_v14  ;;  %v3644_v17 = vpack.c.bf16 %v2206_v27, %v2205_v26 }
 0xd97   :  { %3623 = vmatpush3.bf16.msra.mxu1 %v3620_v14  ;;  %v2208_v14 = vld [vmem:[#allocation2 + $0x728] sm:$0xff] }
 0xe51   :  { %v3090_v53 = vpop.f32.mrb[34].mxu1 }
 0xe52   :  { %v1969_v57 = vadd.f32 %v3090_v53, %v2338_v59  ;;  %v1963_v30 = vpop.f32.mrb[35].mxu1 }
 0xe53   :  { %v1964_v40 = vadd.f32 %v2338_v59, %v1963_v30 }
 0xe54   :  { %v4009_v41 = vadd.f32 %v1969_v57, %v3941_v21  ;;  %v1203_v21 = vld [vmem:[#allocation2 + $0x5d0] sm:$0xff] }
 0xe55   :  { %v4012_v42 = vadd.f32 %v1964_v40, %v3939_v20  ;;  %v1204_v20 = vld [vmem:[#allocation2 + $0x5d8] sm:$0xff]  ;;  %v2339_v40 = vld [vmem:[#allocation2 + $0x6b6] ss:$0 sm:$0xff] }
 0xe56   :  { %1976 = vadd.xlane.f32.xlu1 %v4009_v41  ;;  %v1981_v43 = vmul.f32 %v4009_v41, %v4009_v41  ;;  %v3572_v49 = vpack.c.bf16 %v1204_v20, %v1203_v21 }
 0xe57   :  { %1974 = vadd.xlane.f32.xlu0 %v4012_v42  ;;  %v1980_v44 = vmul.f32 %v4012_v42, %v4012_v42 }
 0xe58   :  { %3573 = vmatprep.subr.bf16.mxu0 %v3572_v49 }
 0xe59   :  { %3575 = vmatpush3.bf16.msra.mxu0 %v3572_v49 }
 0xe5a   :  { %1984 = vadd.xlane.f32.xlu1 %v1981_v43  ;;  %3577 = vmatprep.subr.bf16.mxu0 %v3576_v56 }
 0xe5b   :  { %1982 = vadd.xlane.f32.xlu0 %v1980_v44 }
 0xe5d   :  { %3579 = vmatpush3.bf16.msra.mxu0 %v3576_v56  ;;  %v3624_v56 = vpack.c.bf16 %v1230_v54, %v1229_v51 }
 0xe5e   :  { %3581 = vmatprep.subr.bf16.mxu0 %v3580_v0 }
 0xe5f   :  { %3625 = vmatprep.subr.bf16.mxu1 %v3624_v56 }
 0xe60   :  { %3627 = vmatpush3.bf16.msra.mxu1 %v3624_v56 }
 0xe61   :  { %3583 = vmatpush3.bf16.msra.mxu0 %v3580_v0 }
 0xe62   :  { %3585 = vmatprep.subr.bf16.mxu0 %v3584_v3 }
 0xe65   :  { %3587 = vmatpush3.bf16.msra.mxu0 %v3584_v3  ;;  %v2195_v3 = vld [vmem:[#allocation2 + $0x6c0] sm:$0xff] }
 0xe66   :  { %3589 = vmatprep.subr.bf16.mxu0 %v3588_v8 }
 0xe69   :  { %3591 = vmatpush3.bf16.msra.mxu0 %v3588_v8  ;;  %v3629_v8 = vpack.c.bf16 %v2196_v4, %v2195_v3 }
 0xe6a   :  { %3593 = vmatprep.subr.bf16.mxu0 %v3592_v15 }
 0xe6d   :  { %3595 = vmatpush3.bf16.msra.mxu0 %v3592_v15 }
 0xe6e   :  { %3628 = vmatprep.subr.bf16.mxu0 %v3805_v7 }
 0xee3   :  { %v1977_v29 = vpop.xlane.xlu1 %1976 }
 0xee4   :  { %v1979_v33 = vmul.f32 0.03125, %v1977_v29  ;;  %v1975_v32 = vpop.xlane.xlu0 %1974  ;;  %v3647_v29 = vpack.c.bf16 %v2208_v14, %v2207_v28 }
 0xee5   :  { %v1978_v31 = vmul.f32 0.03125, %v1975_v32  ;;  %v2210_v32 = vld [vmem:[#allocation2 + $0x738] sm:$0xff] }
 0xee6   :  { %v1989_v50 = vmul.f32 %v1979_v33, %v1979_v33  ;;  %v1997_v53 = vsub.f32 %v4009_v41, %v1979_v33  ;;  %v2341_v41 = vld [vmem:[#allocation2 + $0x6b4] ss:$0 sm:$0xff] }
 0xee7   :  { %v1985_v34 = vpop.xlane.xlu1 %1984  ;;  %v1988_v55 = vmul.f32 %v1978_v31, %v1978_v31  ;;  %v1996_v30 = vsub.f32 %v4012_v42, %v1978_v31  ;;  %v2209_v33 = vld [vmem:[#allocation2 + $0x730] sm:$0xff] }
 0xee8   :  { %v1987_v48 = vmul.f32 0.03125, %v1985_v34  ;;  %v1983_v35 = vpop.xlane.xlu0 %1982  ;;  %v3650_v31 = vpack.c.bf16 %v2210_v32, %v2209_v33 }
 0xee9   :  { %v1986_v36 = vmul.f32 0.03125, %v1983_v35 }
 0xeea   :  { %v1991_v52 = vsub.f32 %v1987_v48, %v1989_v50 }
 0xeeb   :  { %v1990_v37 = vsub.f32 %v1986_v36, %v1988_v55 }
 0xeec   :  { %v1993_v39 = vadd.f32 1e-05, %v1991_v52 }
 0xeed   :  { %v1992_v59 = vadd.f32 1e-05, %v1990_v37 }
 0xeee   :  { %3731 = vrsqrt.f32 %v1993_v39 }
 0xeef   :  { %3733 = vrsqrt.f32 %v1992_v59  ;;  %v2343_v59 = vld [vmem:[#allocation2 + $0x6b8] ss:$0 sm:$0xff] }
 0xef8   :  { %v3732_v57 = vpop.eup %3731 }
 0xef9   :  { %v3734_v43 = vpop.eup %3733  ;;  %v1999_v44 = vmul.f32 %v3732_v57, %v1997_v53  ;;  %v2344_v57 = vld [vmem:[#allocation2 + $0x6b9] ss:$0 sm:$0xff] }
 0xefa   :  { %v1998_v45 = vmul.f32 %v3734_v43, %v1996_v30 }
 0xefb   :  { %v2005_v47 = vmul.f32 %v2339_v40, %v1999_v44  ;;  %v2345_v44 = vld [vmem:[#allocation2 + $0x740] ss:$0 sm:$0xff] }
 0xefc   :  { %v2004_v21 = vmul.f32 %v2339_v40, %v1998_v45 }
 0xefd   :  { %v2011_v49 = vadd.f32 %v2340_v46, %v2005_v47 }
 0xefe   :  { %v2010_v20 = vadd.f32 %v2340_v46, %v2004_v21 }
 0xf00   :  { %3123 = vmatprep.mubr.f32.mxu0 %v2010_v20 }
 0xf01   :  { %3124 = vmatmul.mubr.f32.vlgmr.msra.gmra.mrb[20].mxu0 %v2011_v49 }
 0xf02   :  { %3630 = vmatpush3.bf16.msra.mxu0 %v3629_v8  ;;  %3193 = vmatprep.mubr.msk.f32.mxu0 %vm3806_vm2, %v3807_v10 }
 0xf03   :  { %3631 = vmatprep.subr.bf16.mxu0 %v3805_v7 }
 0xf06   :  { %3633 = vmatpush3.bf16.msra.mxu0 %v3632_v62 }
 0xf07   :  { %3634 = vmatprep.subr.bf16.mxu0 %v3805_v7 }
 0xf0a   :  { %3636 = vmatpush3.bf16.msra.mxu0 %v3635_v22 }
 0xf0b   :  { %3637 = vmatprep.subr.bf16.mxu0 %v3805_v7 }
 0xf0e   :  { %3639 = vmatpush3.bf16.msra.mxu0 %v3638_v6 }
 0xf0f   :  { %3640 = vmatprep.subr.bf16.mxu0 %v3805_v7 }
 0xf12   :  { %3642 = vmatpush3.bf16.msra.mxu0 %v3641_v25 }
 0xf13   :  { %3643 = vmatprep.subr.bf16.mxu0 %v3805_v7 }
 0xf16   :  { %3645 = vmatpush3.bf16.msra.mxu0 %v3644_v17 }
 0xf17   :  { %3646 = vmatprep.subr.bf16.mxu0 %v3805_v7 }
 0xf1a   :  { %3648 = vmatpush3.bf16.msra.mxu0 %v3647_v29 }
 0xf1b   :  { %3649 = vmatprep.subr.bf16.mxu0 %v3805_v7 }
 0xf1e   :  { %3651 = vmatpush3.bf16.msra.mxu0 %v3650_v31 }
 0xfd4   :  { %v3125_v58 = vpop.f32.mrb[20].mxu0 }
 0xfd5   :  { %v2088_v60 = vadd.f32 %v3125_v58, %v2341_v41  ;;  %v2082_v42 = vpop.f32.mrb[21].mxu0 }
 0xfd6   :  { %v2083_v61 = vadd.f32 %v2341_v41, %v2082_v42 }
 0xfd7   :  { %v2092_v2 = vmax.f32 %v2088_v60, 0.0 }
 0xfd8   :  { %v2091_v0 = vmax.f32 %v2083_v61, 0.0 }
 0xfda   :  { %3158 = vmatprep.mubr.f32.mxu1 %v2091_v0 }
 0xfdb   :  { %3159 = vmatmul.mubr.f32.vlgmr.msra.gmra.mrb[36].mxu1 %v2092_v2 }
0x10ae   :  { %v3160_v12 = vpop.f32.mrb[36].mxu1 }
0x10af   :  { %v2168_v15 = vadd.f32 %v3160_v12, %v2342_v11  ;;  %v2163_v16 = vpop.f32.mrb[37].mxu1 }
0x10b1   :  { %v2171_v18 = vadd.f32 %v2168_v15, %v2011_v49 }
0x10b3   :  { %2172 = vadd.xlane.f32.xlu0 %v2171_v18  ;;  %v2175_v19 = vmul.f32 %v2171_v18, %v2171_v18 }
0x10b5   :  { %2176 = vadd.xlane.f32.xlu1 %v2175_v19 }
0x1140   :  { %v2173_v34 = vpop.xlane.xlu0 %2172 }
0x1141   :  { %v2174_v50 = vmul.f32 0.03125, %v2173_v34 }
0x1142   :  { %v2177_v48 = vpop.xlane.xlu1 %2176 }
0x1143   :  { %v2179_v35 = vmul.f32 %v2174_v50, %v2174_v50  ;;  %v2178_v55 = vmul.f32 0.03125, %v2177_v48  ;;  %v2183_v37 = vsub.f32 %v2171_v18, %v2174_v50 }
0x1145   :  { %v2180_v36 = vsub.f32 %v2178_v55, %v2179_v35 }
0x1147   :  { %v2181_v52 = vadd.f32 1e-05, %v2180_v36 }
0x1149   :  { %3735 = vrsqrt.f32 %v2181_v52 }
0x1153   :  { %v3736_v39 = vpop.eup %3735 }
0x1154   :  { %v2184_v53 = vmul.f32 %v3736_v39, %v2183_v37 }
0x1156   :  { %v2189_v30 = vmul.f32 %v2343_v59, %v2184_v53 }
0x1158   :  { %v2194_v40 = vadd.f32 %v2344_v57, %v2189_v30 }
0x115a   :  { %v2217_v43 = vrot.slane %v2194_v40, 6 }
0x115c   :  { %3194 = vmatmul.mubr.f32.vlgmr.msra.gmra.mrb[22].mxu0 %v2217_v43 }
0x122f   :  { %v2285_v45 = vpop.f32.mrb[22].mxu0 }
0x1230   :  { %v2286_v46 = vadd.f32 %v2345_v44, %v2285_v45  ;;  %v3195_v47 = vpop.f32.mrb[23].mxu0 }
0x1232   :  { %2289 = vst [vmem:[#allocation5] sm:$0x3] %v2286_v46 }
0x1233   :  { %3787 = shalt.err (!%p3784_p12)
}
0x1234   :  { %s3788_s30 = scalar_lea.hbm %s4036_s2, 32 }
0x1235   :  { %p3789_p13 = scmp.ne.s32.totalorder %s4036_s2, %s3788_s30  ;;  %p3792_p0 = scmp.lt.u32.totalorder %s3788_s30, %s4036_s2 }
0x1237   :  { %p3794_p1 = pnand %p3792_p0, %p3789_p13 }
0x1239   :  { %3797 = shalt.err (!%p3794_p1)
}
0x123a   :  { %2299 = dma.vmem_to_hbm [thread:$0]  %s2297_s26, 32, %s4036_s2, [#allocation4]  }
0x123b   :  { %3800 = dma.done.wait [#allocation4], 32  }
0x123c   :  { %3801 = vsyncadd [#allocation4], 4294967264 }
0x123d   :  { %2303 = vsyncpa [#allocation3], 1 }
0x123e   :  { %2304 = vsyncpa [#allocation4], 1 }

</bundles_post_ra>
